<compile_context>
chip_gen: v7x
topology: tpu7x:2x2x1
jax: 0.10.0
libtpu: 0.0.40
codegen_flags: <defaults>
</compile_context>

<pallas_src>
import functools

import jax
import jax.numpy as jnp
from jax.experimental import pallas as pl
from jax.experimental.pallas import tpu as pltpu


def _round_up(n, m):
    return ((n + m - 1) // m) * m


def latent_encoder_kernel(x_ref, w1_ref, b1_ref, w2_ref, b2_ref,
                          w3_ref, b3_ref, mu_ref, sigma_ref):
    """One batch tile: 3-layer MLP -> (mu, sigma = exp(log_var))."""
    # In-kernel cast to the weight dtype (bf16 path): a cheap VPU op that
    # avoids a separate XLA cast pass over x in HBM.
    x = x_ref[...].astype(w1_ref.dtype)

    # Layer 1: Linear(input_dim -> 128) + ReLU  (f32 accumulation)
    h1 = jnp.dot(x, w1_ref[...], preferred_element_type=jnp.float32) + b1_ref[...]
    h1 = jnp.maximum(h1, 0.0).astype(w2_ref.dtype)

    # Layer 2: Linear(128 -> 64) + ReLU
    h2 = jnp.dot(h1, w2_ref[...], preferred_element_type=jnp.float32) + b2_ref[...]
    h2 = jnp.maximum(h2, 0.0).astype(w3_ref.dtype)

    # Layer 3: Linear(64 -> 2*d_lat), no activation
    raw = jnp.dot(h2, w3_ref[...], preferred_element_type=jnp.float32) + b3_ref[...]

    # torch.chunk(out, 2, dim=1): lanes [0, d_lat) = mu, [d_lat, 2*d_lat) = log_var.
    d_lat = mu_ref.shape[-1]
    mu_ref[...] = raw[:, :d_lat].astype(mu_ref.dtype)
    # NOTE: pad rows of a partial last tile flow through exp and may become
    # inf; those rows are never written back (OOB stores dropped) — benign.
    sigma_ref[...] = jnp.exp(raw[:, d_lat:]).astype(sigma_ref.dtype)


def latent_encoder(x, params, *, tb=1024, use_bf16=False):
    """LatentEncoder forward pass. Returns (mu, sigma).

    tb: batch tile.  Only 8-row (sublane) granularity is needed for M; pick
        the tile by DMA size / per-step overhead (sweep 512/1024/2048 at
        large B).  Clamped for small batches.
    use_bf16: run the matmuls with bf16 operands (f32 accumulation).  x is
        cast inside the kernel; only the tiny weight matrices are cast here.
    """
    w1, b1, w2, b2, w3, b3 = params
    out_dtype = x.dtype
    if use_bf16:
        w1, w2, w3 = (w.astype(jnp.bfloat16) for w in (w1, w2, w3))

    B, in_dim = x.shape
    h1d, h2d = w1.shape[1], w2.shape[1]
    d_out = w3.shape[1]
    d_lat = d_out // 2

    # Clamp the batch tile for small B while keeping sublane (8) alignment.
    tb = min(tb, _round_up(B, 8))
    grid = (pl.cdiv(B, tb),)
    # v7x: with dimension_semantics=("parallel",) batch tiles shard across
    # the 2 TensorCores — for large B keep the grid even and >= 2 (ideally
    # >= 4 tiles per core).  VMEM use (weights ~45 KB + tb*128*4 B for h1 +
    # double-buffered x/out) stays far below the 32 MiB scoped default for
    # any reasonable tb.

    # Small weights/biases: whole-array VMEM residents (un-blocked -> no
    # double-buffering, no per-grid-step DMA bookkeeping).
    vmem_full = pl.BlockSpec(memory_space=pltpu.MemorySpace.VMEM)

    weight_bytes = sum(a.size * a.dtype.itemsize for a in (w1, b1, w2, b2, w3, b3))
    out_bytes = 2 * B * d_lat * jnp.dtype(out_dtype).itemsize
    cost = pl.CostEstimate(
        flops=2 * B * (in_dim * h1d + h1d * h2d + h2d * d_out),
        transcendentals=B * d_lat,  # only the log_var half is exp'd
        bytes_accessed=x.size * x.dtype.itemsize + weight_bytes + out_bytes,
    )

    mu, sigma = pl.pallas_call(
        latent_encoder_kernel,
        out_shape=(jax.ShapeDtypeStruct((B, d_lat), out_dtype),
                   jax.ShapeDtypeStruct((B, d_lat), out_dtype)),
        grid=grid,
        in_specs=[
            pl.BlockSpec((tb, in_dim), lambda i: (i, 0)),   # x, batch-tiled
            vmem_full, vmem_full,                           # W1, b1
            vmem_full, vmem_full,                           # W2, b2
            vmem_full, vmem_full,                           # W3, b3
        ],
        out_specs=(pl.BlockSpec((tb, d_lat), lambda i: (i, 0)),   # mu
                   pl.BlockSpec((tb, d_lat), lambda i: (i, 0))),  # sigma
        compiler_params=pltpu.CompilerParams(
            dimension_semantics=("parallel",)),  # shard tiles across v7x's 2 TCs
        cost_estimate=cost,
    )(x, w1, b1, w2, b2, w3, b3)

    return mu, sigma


def init_params(key, input_dim, d_het_latent):
    """Deterministic init mirroring make_net([input_dim, 128, 64, 2*d_lat])."""
    dims = [input_dim, 128, 64, 2 * d_het_latent]
    params = []
    for i in range(len(dims) - 1):
        key, kw, kb = jax.random.split(key, 3)
        bound = 1.0 / jnp.sqrt(dims[i])
        # stored as (in, out) so the kernel computes x @ W + b
        # (equivalent to torch's x @ W.T + b with W of shape (out, in)).
        w = jax.random.uniform(kw, (dims[i], dims[i + 1]), jnp.float32,
                               minval=-bound, maxval=bound)
        b = jax.random.uniform(kb, (1, dims[i + 1]), jnp.float32,
                               minval=-bound, maxval=bound)
        params += [w, b]
    return tuple(params)


def reference_forward(x, params):
    """Plain-JAX reference of the same forward pass."""
    w1, b1, w2, b2, w3, b3 = params
    h1 = jnp.maximum(x @ w1 + b1, 0.0)
    h2 = jnp.maximum(h1 @ w2 + b2, 0.0)
    out = h2 @ w3 + b3
    d_lat = out.shape[1] // 2
    return out[:, :d_lat], jnp.exp(out[:, d_lat:])


if __name__ == "__main__":
    # Module-consistent shapes: d_traits=8, d_beliefs=8 -> input_dim=16,
    # d_het_latent=8 -> final layer width 16 (mu and sigma each 8 wide).
    # NOTE: at B=512 the whole problem is ~5.8 MFLOP / ~80 KB of HBM traffic —
    # the kernel only pays off for much larger B or when fused into a bigger
    # surrounding computation; this size is just the correctness demo.
    d_traits, d_beliefs, d_het_latent = 8, 8, 8
    input_dim = d_traits + d_beliefs
    batch = 512

    key = jax.random.PRNGKey(0)
    key, kx = jax.random.split(key)
    x = jax.random.normal(kx, (batch, input_dim), dtype=jnp.float32)
    params = init_params(key, input_dim, d_het_latent)

    # f32 path for the 1e-5 tolerance check; set use_bf16=True (and loosen
    # tolerances) for native-rate bf16 MXU, especially on v5e.
    fwd = jax.jit(functools.partial(latent_encoder, tb=1024, use_bf16=False))
    mu, sigma = fwd(x, params)
    jax.block_until_ready((mu, sigma))

    mu_ref, sigma_ref = reference_forward(x, params)
    assert mu.shape == (batch, d_het_latent) and sigma.shape == (batch, d_het_latent)
    assert jnp.allclose(mu, mu_ref, atol=1e-5, rtol=1e-5)
    assert jnp.allclose(sigma, sigma_ref, atol=1e-5, rtol=1e-5)

    print("KERNEL_OK")
</pallas_src>

<mosaic_0001>
module attributes {stable_mosaic.version = 11 : i64} {
  func.func @latent_encoder_kernel(%arg0: i32, %arg1: memref<512x16xf32, #tpu.memory_space<vmem>>, %arg2: memref<16x128xf32, #tpu.memory_space<vmem>>, %arg3: memref<1x128xf32, #tpu.memory_space<vmem>>, %arg4: memref<128x64xf32, #tpu.memory_space<vmem>>, %arg5: memref<1x64xf32, #tpu.memory_space<vmem>>, %arg6: memref<64x16xf32, #tpu.memory_space<vmem>>, %arg7: memref<1x16xf32, #tpu.memory_space<vmem>>, %arg8: memref<512x8xf32, #tpu.memory_space<vmem>>, %arg9: memref<512x8xf32, #tpu.memory_space<vmem>>) attributes {dimension_semantics = [#tpu.dimension_semantics<parallel>], iteration_bounds = array<i64: 1>, scalar_prefetch = 0 : i64, scratch_operands = 0 : i64, tpu.core_type = #tpu.core_type<tc>, window_params = [{transform_indices = @transform_0, window_bounds = array<i64: 512, 16>}, {pipeline_mode = #tpu.pipeline_mode<synchronous>, transform_indices = @transform_1, window_bounds = array<i64: 16, 128>}, {pipeline_mode = #tpu.pipeline_mode<synchronous>, transform_indices = @transform_2, window_bounds = array<i64: 1, 128>}, {pipeline_mode = #tpu.pipeline_mode<synchronous>, transform_indices = @transform_3, window_bounds = array<i64: 128, 64>}, {pipeline_mode = #tpu.pipeline_mode<synchronous>, transform_indices = @transform_4, window_bounds = array<i64: 1, 64>}, {pipeline_mode = #tpu.pipeline_mode<synchronous>, transform_indices = @transform_5, window_bounds = array<i64: 64, 16>}, {pipeline_mode = #tpu.pipeline_mode<synchronous>, transform_indices = @transform_6, window_bounds = array<i64: 1, 16>}, {transform_indices = @transform_7, window_bounds = array<i64: 512, 8>}, {transform_indices = @transform_8, window_bounds = array<i64: 512, 8>}]} {
    %c0 = arith.constant 0 : index
    %c0_0 = arith.constant 0 : index
    %0 = vector.load %arg1[%c0, %c0_0] : memref<512x16xf32, #tpu.memory_space<vmem>>, vector<512x16xf32>
    %c0_1 = arith.constant 0 : index
    %c0_2 = arith.constant 0 : index
    %1 = vector.load %arg2[%c0_1, %c0_2] : memref<16x128xf32, #tpu.memory_space<vmem>>, vector<16x128xf32>
    %cst = arith.constant dense<0.000000e+00> : vector<512x128xf32>
    %2 = tpu.matmul %0, %1, %cst {dimension_numbers = #tpu.dot_dimension_numbers<[1], [0], [0], [1], [0, 0, 1, 1], [], []>} : vector<512x16xf32>, vector<16x128xf32>, vector<512x128xf32> -> vector<512x128xf32>
    %c0_3 = arith.constant 0 : index
    %c0_4 = arith.constant 0 : index
    %3 = vector.load %arg3[%c0_3, %c0_4] : memref<1x128xf32, #tpu.memory_space<vmem>>, vector<1x128xf32>
    %4 = vector.broadcast %3 : vector<1x128xf32> to vector<512x128xf32>
    %5 = arith.addf %2, %4 : vector<512x128xf32>
    %cst_5 = arith.constant 0.000000e+00 : f32
    %6 = vector.broadcast %cst_5 : f32 to vector<512x128xf32>
    %7 = arith.maximumf %5, %6 : vector<512x128xf32>
    %c0_6 = arith.constant 0 : index
    %c0_7 = arith.constant 0 : index
    %8 = vector.load %arg4[%c0_6, %c0_7] : memref<128x64xf32, #tpu.memory_space<vmem>>, vector<128x64xf32>
    %cst_8 = arith.constant dense<0.000000e+00> : vector<512x64xf32>
    %9 = tpu.matmul %7, %8, %cst_8 {dimension_numbers = #tpu.dot_dimension_numbers<[1], [0], [0], [1], [0, 0, 1, 1], [], []>} : vector<512x128xf32>, vector<128x64xf32>, vector<512x64xf32> -> vector<512x64xf32>
    %c0_9 = arith.constant 0 : index
    %c0_10 = arith.constant 0 : index
    %10 = vector.load %arg5[%c0_9, %c0_10] : memref<1x64xf32, #tpu.memory_space<vmem>>, vector<1x64xf32>
    %11 = vector.broadcast %10 : vector<1x64xf32> to vector<512x64xf32>
    %12 = arith.addf %9, %11 : vector<512x64xf32>
    %cst_11 = arith.constant 0.000000e+00 : f32
    %13 = vector.broadcast %cst_11 : f32 to vector<512x64xf32>
    %14 = arith.maximumf %12, %13 : vector<512x64xf32>
    %c0_12 = arith.constant 0 : index
    %c0_13 = arith.constant 0 : index
    %15 = vector.load %arg6[%c0_12, %c0_13] : memref<64x16xf32, #tpu.memory_space<vmem>>, vector<64x16xf32>
    %cst_14 = arith.constant dense<0.000000e+00> : vector<512x16xf32>
    %16 = tpu.matmul %14, %15, %cst_14 {dimension_numbers = #tpu.dot_dimension_numbers<[1], [0], [0], [1], [0, 0, 1, 1], [], []>} : vector<512x64xf32>, vector<64x16xf32>, vector<512x16xf32> -> vector<512x16xf32>
    %c0_15 = arith.constant 0 : index
    %c0_16 = arith.constant 0 : index
    %17 = vector.load %arg7[%c0_15, %c0_16] : memref<1x16xf32, #tpu.memory_space<vmem>>, vector<1x16xf32>
    %18 = vector.broadcast %17 : vector<1x16xf32> to vector<512x16xf32>
    %19 = arith.addf %16, %18 : vector<512x16xf32>
    %20 = vector.extract_strided_slice %19 {offsets = [0, 0], sizes = [512, 8], strides = [1, 1]} : vector<512x16xf32> to vector<512x8xf32>
    %c0_17 = arith.constant 0 : index
    %c0_18 = arith.constant 0 : index
    %21 = vector.load %arg8[%c0_17, %c0_18] : memref<512x8xf32, #tpu.memory_space<vmem>>, vector<512x8xf32>
    tpu.vector_store %arg8[%c0_17, %c0_18], %20 {strides = array<i32>} : memref<512x8xf32, #tpu.memory_space<vmem>>, vector<512x8xf32>,
    %22 = vector.extract_strided_slice %19 {offsets = [0, 8], sizes = [512, 8], strides = [1, 1]} : vector<512x16xf32> to vector<512x8xf32>
    %23 = math.exp %22 : vector<512x8xf32>
    %c0_19 = arith.constant 0 : index
    %c0_20 = arith.constant 0 : index
    %24 = vector.load %arg9[%c0_19, %c0_20] : memref<512x8xf32, #tpu.memory_space<vmem>>, vector<512x8xf32>
    tpu.vector_store %arg9[%c0_19, %c0_20], %23 {strides = array<i32>} : memref<512x8xf32, #tpu.memory_space<vmem>>, vector<512x8xf32>,
    return
  }
  func.func @transform_0(%arg0: i32) -> (i32, i32) {
    %c0_i32 = arith.constant 0 : i32
    %c0_i32_0 = arith.constant 0 : i32
    return %arg0, %c0_i32 : i32, i32
  }
  func.func @transform_1(%arg0: i32) -> (i32, i32) {
    %c0_i32 = arith.constant 0 : i32
    %c0_i32_0 = arith.constant 0 : i32
    %c0_i32_1 = arith.constant 0 : i32
    return %c0_i32, %c0_i32_0 : i32, i32
  }
  func.func @transform_2(%arg0: i32) -> (i32, i32) {
    %c0_i32 = arith.constant 0 : i32
    %c0_i32_0 = arith.constant 0 : i32
    %c0_i32_1 = arith.constant 0 : i32
    return %c0_i32, %c0_i32_0 : i32, i32
  }
  func.func @transform_3(%arg0: i32) -> (i32, i32) {
    %c0_i32 = arith.constant 0 : i32
    %c0_i32_0 = arith.constant 0 : i32
    %c0_i32_1 = arith.constant 0 : i32
    return %c0_i32, %c0_i32_0 : i32, i32
  }
  func.func @transform_4(%arg0: i32) -> (i32, i32) {
    %c0_i32 = arith.constant 0 : i32
    %c0_i32_0 = arith.constant 0 : i32
    %c0_i32_1 = arith.constant 0 : i32
    return %c0_i32, %c0_i32_0 : i32, i32
  }
  func.func @transform_5(%arg0: i32) -> (i32, i32) {
    %c0_i32 = arith.constant 0 : i32
    %c0_i32_0 = arith.constant 0 : i32
    %c0_i32_1 = arith.constant 0 : i32
    return %c0_i32, %c0_i32_0 : i32, i32
  }
  func.func @transform_6(%arg0: i32) -> (i32, i32) {
    %c0_i32 = arith.constant 0 : i32
    %c0_i32_0 = arith.constant 0 : i32
    %c0_i32_1 = arith.constant 0 : i32
    return %c0_i32, %c0_i32_0 : i32, i32
  }
  func.func @transform_7(%arg0: i32) -> (i32, i32) {
    %c0_i32 = arith.constant 0 : i32
    %c0_i32_0 = arith.constant 0 : i32
    return %arg0, %c0_i32 : i32, i32
  }
  func.func @transform_8(%arg0: i32) -> (i32, i32) {
    %c0_i32 = arith.constant 0 : i32
    %c0_i32_0 = arith.constant 0 : i32
    return %arg0, %c0_i32 : i32, i32
  }
}

</mosaic_0001>

<bundles_post_ra>
// kernel: latent_encoder.1
= control target key start
LH: loop header
LB: loop body
LE: loop exit
PB: predicated region body
PF: predicated region fallthrough
CT: control target
= control target key end

     0   :  { %vm101_vm0 = vcmask 130048   ;;  %vm1230_vm1 = vcmask 523264   ;;  %vm1808_vm2 = vcmask 64512   ;;  %s3201_s13 = smov 120   ;;  %s4524_s1 = inlined_call_operand.vmem [shape: f32[16,128], index: 1, kind: input, shape index: {}]   ;;  %s4525_s0 = inlined_call_operand.vmem [shape: f32[512,16], index: 0, kind: input, shape index: {}]   ;;  %s4526_s3 = inlined_call_operand.vmem [shape: f32[128,64], index: 3, kind: input, shape index: {}]   ;;  %s4527_s2 = inlined_call_operand.vmem [shape: f32[1,128], index: 2, kind: input, shape index: {}]   ;;  %s4528_s5 = inlined_call_operand.vmem [shape: f32[64,16], index: 5, kind: input, shape index: {}]   ;;  %s4529_s4 = inlined_call_operand.vmem [shape: f32[1,64], index: 4, kind: input, shape index: {}]   ;;  %s4530_s6 = inlined_call_operand.vmem [shape: f32[1,16], index: 6, kind: input, shape index: {}]   ;;  %s4531_s7 = inlined_call_operand.vmem [shape: f32[512,8], index: 7, kind: output, shape index: {0}]   ;;  %s4532_s8 = inlined_call_operand.vmem [shape: f32[512,8], index: 8, kind: output, shape index: {1}]  }
   0x1   :  { %v92_v0 = vld [vmem:[%s4524_s1] sm:$0xff]  ;;  %v93_v1 = vld [vmem:[%s4524_s1 + $0x8] sm:$0xff]  ;;  %v30_v5 = vld [vmem:[%s4525_s0 + $0x10] sm:$0xff] }
   0x2   :  { %v28_v2 = vld [vmem:[%s4525_s0] sm:$0xff]  ;;  %v3018_v3 = vpack.c.bf16 %v93_v1, %v92_v0  ;;  %v29_v4 = vld [vmem:[%s4525_s0 + $0x8] sm:$0xff]  ;;  %v31_v6 = vld [vmem:[%s4525_s0 + $0x18] sm:$0xff] }
   0x3   :  { %2682 = vmatprep.mubr.msk.f32.mxu0 %vm101_vm0, %v28_v2  ;;  %v32_v7 = vld [vmem:[%s4525_s0 + $0x20] sm:$0xff]  ;;  %v61_v9 = vld [vmem:[%s4525_s0 + $0x108] sm:$0xff]  ;;  %v62_v11 = vld [vmem:[%s4525_s0 + $0x110] sm:$0xff] }
   0x4   :  { %3019 = vmatprep.subr.bf16.mxu0 %v3018_v3  ;;  %3070 = vmatprep.subr.bf16.mxu1 %v3018_v3  ;;  %v60_v8 = vld [vmem:[%s4525_s0 + $0x100] sm:$0xff]  ;;  %v33_v10 = vld [vmem:[%s4525_s0 + $0x28] sm:$0xff]  ;;  %v34_v12 = vld [vmem:[%s4525_s0 + $0x30] sm:$0xff] }
   0x5   :  { %3021 = vmatpush3.bf16.msra.mxu0 %v3018_v3  ;;  %3071 = vmatpush3.bf16.msra.mxu1 %v3018_v3  ;;  %v63_v13 = vld [vmem:[%s4525_s0 + $0x118] sm:$0xff]  ;;  %v64_v14 = vld [vmem:[%s4525_s0 + $0x120] sm:$0xff]  ;;  %v65_v17 = vld [vmem:[%s4525_s0 + $0x128] sm:$0xff] }
   0x6   :  { %2730 = vmatprep.mubr.msk.f32.mxu1 %vm101_vm0, %v60_v8  ;;  %v35_v15 = vld [vmem:[%s4525_s0 + $0x38] sm:$0xff]  ;;  %v36_v16 = vld [vmem:[%s4525_s0 + $0x40] sm:$0xff]  ;;  %v66_v18 = vld [vmem:[%s4525_s0 + $0x130] sm:$0xff] }
   0x7   :  { %v37_v19 = vld [vmem:[%s4525_s0 + $0x48] sm:$0xff]  ;;  %v38_v20 = vld [vmem:[%s4525_s0 + $0x50] sm:$0xff]  ;;  %v67_v21 = vld [vmem:[%s4525_s0 + $0x138] sm:$0xff] }
   0x8   :  { %2683 = vmatmul.mubr.msk.f32.vlgmr.msra.gmra.mrb[0].mxu0 %vm101_vm0, %v29_v4  ;;  %2731 = vmatmul.mubr.msk.f32.vlgmr.msra.gmra.mrb[0].mxu1 %vm101_vm0, %v61_v9  ;;  %v743_v22 = vld [vmem:[%s4526_s3] sm:$0xff]  ;;  %v744_v23 = vld [vmem:[%s4526_s3 + $0x8] sm:$0xff]  ;;  %v745_v24 = vld [vmem:[%s4526_s3 + $0x10] sm:$0xff] }
   0x9   :  { %2685 = vmatprep.mubr.msk.f32.mxu0 %vm101_vm0, %v30_v5  ;;  %2733 = vmatprep.mubr.msk.f32.mxu1 %vm101_vm0, %v62_v11  ;;  %v68_v25 = vld [vmem:[%s4525_s0 + $0x140] sm:$0xff]  ;;  %v3022_v26 = vpack.c.bf16 %v744_v23, %v743_v22  ;;  %v746_v27 = vld [vmem:[%s4526_s3 + $0x18] sm:$0xff]  ;;  %v748_v31 = vld [vmem:[%s4526_s3 + $0x28] sm:$0xff] }
   0xa   :  { %v39_v28 = vld [vmem:[%s4525_s0 + $0x58] sm:$0xff]  ;;  %v3026_v29 = vpack.c.bf16 %v746_v27, %v745_v24  ;;  %v747_v30 = vld [vmem:[%s4526_s3 + $0x20] sm:$0xff]  ;;  %v69_v33 = vld [vmem:[%s4525_s0 + $0x148] sm:$0xff] }
   0xb   :  { %v40_v32 = vld [vmem:[%s4525_s0 + $0x60] sm:$0xff]  ;;  %3023 = vmatprep.subr.bf16.mxu1 %v3022_v26  ;;  %v70_v34 = vld [vmem:[%s4525_s0 + $0x150] sm:$0xff]  ;;  %v3030_v35 = vpack.c.bf16 %v748_v31, %v747_v30  ;;  %v41_v36 = vld [vmem:[%s4525_s0 + $0x68] sm:$0xff] }
   0xc   :  { %2686 = vmatmul.mubr.msk.f32.gmra.mrb[2].mxu0 %vm101_vm0, %v31_v6  ;;  %2734 = vmatmul.mubr.msk.f32.gmra.mrb[2].mxu1 %vm101_vm0, %v63_v13  ;;  %v749_v37 = vld [vmem:[%s4526_s3 + $0x30] sm:$0xff]  ;;  %v750_v38 = vld [vmem:[%s4526_s3 + $0x38] sm:$0xff]  ;;  %v72_v41 = vld [vmem:[%s4525_s0 + $0x160] sm:$0xff] }
   0xd   :  { %2688 = vmatprep.mubr.msk.f32.mxu0 %vm101_vm0, %v32_v7  ;;  %2736 = vmatprep.mubr.msk.f32.mxu1 %vm101_vm0, %v64_v14  ;;  %v42_v39 = vld [vmem:[%s4525_s0 + $0x70] sm:$0xff]  ;;  %v71_v40 = vld [vmem:[%s4525_s0 + $0x158] sm:$0xff]  ;;  %v3034_v42 = vpack.c.bf16 %v750_v38, %v749_v37  ;;  %v751_v44 = vld [vmem:[%s4526_s3 + $0x40] sm:$0xff] }
   0xe   :  { %3025 = vmatpush3.bf16.msra.mxu1 %v3022_v26  ;;  %v43_v43 = vld [vmem:[%s4525_s0 + $0x78] sm:$0xff]  ;;  %v752_v45 = vld [vmem:[%s4526_s3 + $0x48] sm:$0xff]  ;;  %v44_v46 = vld [vmem:[%s4525_s0 + $0x80] sm:$0xff] }
   0xf   :  { %3027 = vmatprep.subr.bf16.mxu1 %v3026_v29  ;;  %v73_v47 = vld [vmem:[%s4525_s0 + $0x168] sm:$0xff]  ;;  %v74_v48 = vld [vmem:[%s4525_s0 + $0x170] sm:$0xff]  ;;  %v3038_v49 = vpack.c.bf16 %v752_v45, %v751_v44  ;;  %v754_v52 = vld [vmem:[%s4526_s3 + $0x58] sm:$0xff] }
  0x10   :  { %2689 = vmatmul.mubr.msk.f32.gmra.mrb[4].mxu0 %vm101_vm0, %v33_v10  ;;  %2737 = vmatmul.mubr.msk.f32.gmra.mrb[4].mxu1 %vm101_vm0, %v65_v17  ;;  %v45_v50 = vld [vmem:[%s4525_s0 + $0x88] sm:$0xff]  ;;  %v753_v51 = vld [vmem:[%s4526_s3 + $0x50] sm:$0xff]  ;;  %v75_v54 = vld [vmem:[%s4525_s0 + $0x178] sm:$0xff] }
  0x11   :  { %2691 = vmatprep.mubr.msk.f32.mxu0 %vm101_vm0, %v34_v12  ;;  %2739 = vmatprep.mubr.msk.f32.mxu1 %vm101_vm0, %v66_v18  ;;  %v46_v53 = vld [vmem:[%s4525_s0 + $0x90] sm:$0xff]  ;;  %v76_v55 = vld [vmem:[%s4525_s0 + $0x180] sm:$0xff]  ;;  %v3042_v56 = vpack.c.bf16 %v754_v52, %v753_v51  ;;  %v47_v57 = vld [vmem:[%s4525_s0 + $0x98] sm:$0xff] }
  0x12   :  { %3029 = vmatpush3.bf16.msra.mxu1 %v3026_v29  ;;  %v755_v58 = vld [vmem:[%s4526_s3 + $0x60] sm:$0xff]  ;;  %v756_v59 = vld [vmem:[%s4526_s3 + $0x68] sm:$0xff]  ;;  %v78_v62 = vld [vmem:[%s4525_s0 + $0x190] sm:$0xff] }
  0x13   :  { %3031 = vmatprep.subr.bf16.mxu1 %v3030_v35  ;;  %v48_v60 = vld [vmem:[%s4525_s0 + $0xa0] sm:$0xff]  ;;  %v77_v61 = vld [vmem:[%s4525_s0 + $0x188] sm:$0xff]  ;;  %v3046_v63 = vpack.c.bf16 %v756_v59, %v755_v58  ;;  %v757_v1 = vld [vmem:[%s4526_s3 + $0x70] sm:$0xff] }
  0x14   :  { %2692 = vmatmul.mubr.msk.f32.gmra.mrb[6].mxu0 %vm101_vm0, %v35_v15  ;;  %2740 = vmatmul.mubr.msk.f32.gmra.mrb[6].mxu1 %vm101_vm0, %v67_v21  ;;  %v49_v0 = vld [vmem:[%s4525_s0 + $0xa8] sm:$0xff]  ;;  %v758_v2 = vld [vmem:[%s4526_s3 + $0x78] sm:$0xff]  ;;  %v50_v3 = vld [vmem:[%s4525_s0 + $0xb0] sm:$0xff] }
  0x15   :  { %2694 = vmatprep.mubr.msk.f32.mxu0 %vm101_vm0, %v36_v16  ;;  %2742 = vmatprep.mubr.msk.f32.mxu1 %vm101_vm0, %v68_v25  ;;  %v79_v4 = vld [vmem:[%s4525_s0 + $0x198] sm:$0xff]  ;;  %v80_v5 = vld [vmem:[%s4525_s0 + $0x1a0] sm:$0xff]  ;;  %v3050_v6 = vpack.c.bf16 %v758_v2, %v757_v1  ;;  %v81_v9 = vld [vmem:[%s4525_s0 + $0x1a8] sm:$0xff] }
  0x16   :  { %3033 = vmatpush3.bf16.msra.mxu1 %v3030_v35  ;;  %v51_v7 = vld [vmem:[%s4525_s0 + $0xb8] sm:$0xff]  ;;  %v52_v8 = vld [vmem:[%s4525_s0 + $0xc0] sm:$0xff]  ;;  %v82_v10 = vld [vmem:[%s4525_s0 + $0x1b0] sm:$0xff] }
  0x17   :  { %3035 = vmatprep.subr.bf16.mxu1 %v3034_v42  ;;  %v53_v11 = vld [vmem:[%s4525_s0 + $0xc8] sm:$0xff]  ;;  %v54_v12 = vld [vmem:[%s4525_s0 + $0xd0] sm:$0xff]  ;;  %v83_v13 = vld [vmem:[%s4525_s0 + $0x1b8] sm:$0xff] }
  0x18   :  { %2695 = vmatmul.mubr.msk.f32.gmra.mrb[8].mxu0 %vm101_vm0, %v37_v19  ;;  %2743 = vmatmul.mubr.msk.f32.gmra.mrb[8].mxu1 %vm101_vm0, %v69_v33  ;;  %v84_v14 = vld [vmem:[%s4525_s0 + $0x1c0] sm:$0xff]  ;;  %v55_v15 = vld [vmem:[%s4525_s0 + $0xd8] sm:$0xff]  ;;  %v85_v17 = vld [vmem:[%s4525_s0 + $0x1c8] sm:$0xff] }
  0x19   :  { %2697 = vmatprep.mubr.msk.f32.mxu0 %vm101_vm0, %v38_v20  ;;  %2745 = vmatprep.mubr.msk.f32.mxu1 %vm101_vm0, %v70_v34  ;;  %v56_v16 = vld [vmem:[%s4525_s0 + $0xe0] sm:$0xff]  ;;  %v86_v18 = vld [vmem:[%s4525_s0 + $0x1d0] sm:$0xff]  ;;  %v57_v19 = vld [vmem:[%s4525_s0 + $0xe8] sm:$0xff] }
  0x1a   :  { %3037 = vmatpush3.bf16.msra.mxu1 %v3034_v42  ;;  %v58_v20 = vld [vmem:[%s4525_s0 + $0xf0] sm:$0xff]  ;;  %v87_v21 = vld [vmem:[%s4525_s0 + $0x1d8] sm:$0xff]  ;;  %v88_v22 = vld [vmem:[%s4525_s0 + $0x1e0] sm:$0xff] }
  0x1b   :  { %3039 = vmatprep.subr.bf16.mxu1 %v3038_v49  ;;  %v59_v23 = vld [vmem:[%s4525_s0 + $0xf8] sm:$0xff]  ;;  %v89_v24 = vld [vmem:[%s4525_s0 + $0x1e8] sm:$0xff]  ;;  %v90_v25 = vld [vmem:[%s4525_s0 + $0x1f0] sm:$0xff] }
  0x1c   :  { %2698 = vmatmul.mubr.msk.f32.gmra.mrb[10].mxu0 %vm101_vm0, %v39_v28  ;;  %2746 = vmatmul.mubr.msk.f32.gmra.mrb[10].mxu1 %vm101_vm0, %v71_v40  ;;  %v91_v26 = vld [vmem:[%s4525_s0 + $0x1f8] sm:$0xff]  ;;  %v3560_v27 = vld [vmem:[%s4527_s2] ss:$0 sm:$0xff]  ;;  %v1216_v35 = vld [vmem:[%s4528_s5 + $0x8] sm:$0xff] }
  0x1d   :  { %2700 = vmatprep.mubr.msk.f32.mxu0 %vm101_vm0, %v40_v32  ;;  %2748 = vmatprep.mubr.msk.f32.mxu1 %vm101_vm0, %v72_v41  ;;  %v1215_v34 = vld [vmem:[%s4528_s5] sm:$0xff]  ;;  %v1218_v41 = vld [vmem:[%s4528_s5 + $0x18] sm:$0xff] }
  0x1e   :  { %3041 = vmatpush3.bf16.msra.mxu1 %v3038_v49  ;;  %v3054_v40 = vpack.c.bf16 %v1216_v35, %v1215_v34  ;;  %v1219_v45 = vld [vmem:[%s4528_s5 + $0x20] sm:$0xff] }
  0x1f   :  { %3043 = vmatprep.subr.bf16.mxu1 %v3042_v56 }
  0x20   :  { %2701 = vmatmul.mubr.msk.f32.gmra.mrb[12].mxu0 %vm101_vm0, %v41_v36  ;;  %2749 = vmatmul.mubr.msk.f32.gmra.mrb[12].mxu1 %vm101_vm0, %v73_v47  ;;  %v1217_v36 = vld [vmem:[%s4528_s5 + $0x10] sm:$0xff] }
  0x21   :  { %2703 = vmatprep.mubr.msk.f32.mxu0 %vm101_vm0, %v42_v39  ;;  %2751 = vmatprep.mubr.msk.f32.mxu1 %vm101_vm0, %v74_v48  ;;  %v3058_v44 = vpack.c.bf16 %v1218_v41, %v1217_v36 }
  0x22   :  { %3045 = vmatpush3.bf16.msra.mxu1 %v3042_v56  ;;  %3055 = vmatprep.subr.bf16.mxu0 %v3054_v40  ;;  %v1221_v56 = vld [vmem:[%s4528_s5 + $0x30] sm:$0xff] }
  0x23   :  { %3047 = vmatprep.subr.bf16.mxu1 %v3046_v63  ;;  %3057 = vmatpush3.bf16.msra.mxu0 %v3054_v40 }
  0x24   :  { %2704 = vmatmul.mubr.msk.f32.gmra.mrb[14].mxu0 %vm101_vm0, %v43_v43  ;;  %2752 = vmatmul.mubr.msk.f32.gmra.mrb[14].mxu1 %vm101_vm0, %v75_v54 }
  0x25   :  { %2706 = vmatprep.mubr.msk.f32.mxu0 %vm101_vm0, %v44_v46  ;;  %2754 = vmatprep.mubr.msk.f32.mxu1 %vm101_vm0, %v76_v55  ;;  %v1220_v46 = vld [vmem:[%s4528_s5 + $0x28] sm:$0xff] }
  0x26   :  { %3049 = vmatpush3.bf16.msra.mxu1 %v3046_v63  ;;  %3059 = vmatprep.subr.bf16.mxu0 %v3058_v44 }
  0x27   :  { %3051 = vmatprep.subr.bf16.mxu1 %v3050_v6  ;;  %3061 = vmatpush3.bf16.msra.mxu0 %v3058_v44 }
  0x28   :  { %2707 = vmatmul.mubr.msk.f32.gmra.mrb[16].mxu0 %vm101_vm0, %v45_v50  ;;  %2755 = vmatmul.mubr.msk.f32.gmra.mrb[16].mxu1 %vm101_vm0, %v77_v61 }
  0x29   :  { %2709 = vmatprep.mubr.msk.f32.mxu0 %vm101_vm0, %v46_v53  ;;  %2757 = vmatprep.mubr.msk.f32.mxu1 %vm101_vm0, %v78_v62  ;;  %v3062_v53 = vpack.c.bf16 %v1220_v46, %v1219_v45 }
  0x2a   :  { %3053 = vmatpush3.bf16.msra.mxu1 %v3050_v6 }
  0x2b   :  { %3063 = vmatprep.subr.bf16.mxu0 %v3062_v53 }
  0x2c   :  { %2710 = vmatmul.mubr.msk.f32.gmra.mrb[18].mxu0 %vm101_vm0, %v47_v57  ;;  %2758 = vmatmul.mubr.msk.f32.gmra.mrb[18].mxu1 %vm101_vm0, %v79_v4  ;;  %v1222_v57 = vld [vmem:[%s4528_s5 + $0x38] sm:$0xff] }
  0x2d   :  { %2712 = vmatprep.mubr.msk.f32.mxu0 %vm101_vm0, %v48_v60  ;;  %2760 = vmatprep.mubr.msk.f32.mxu1 %vm101_vm0, %v80_v5 }
  0x2e   :  { %3065 = vmatpush3.bf16.msra.mxu0 %v3062_v53 }
  0x30   :  { %2713 = vmatmul.mubr.msk.f32.gmra.mrb[20].mxu0 %vm101_vm0, %v49_v0  ;;  %2761 = vmatmul.mubr.msk.f32.gmra.mrb[20].mxu1 %vm101_vm0, %v81_v9  ;;  %v3066_v0 = vpack.c.bf16 %v1222_v57, %v1221_v56 }
  0x31   :  { %2715 = vmatprep.mubr.msk.f32.mxu0 %vm101_vm0, %v50_v3  ;;  %2763 = vmatprep.mubr.msk.f32.mxu1 %vm101_vm0, %v82_v10 }
  0x32   :  { %3067 = vmatprep.subr.bf16.mxu0 %v3066_v0 }
  0x33   :  { %3069 = vmatpush3.bf16.msra.mxu0 %v3066_v0 }
  0x34   :  { %2716 = vmatmul.mubr.msk.f32.gmra.mrb[22].mxu0 %vm101_vm0, %v51_v7  ;;  %2764 = vmatmul.mubr.msk.f32.gmra.mrb[22].mxu1 %vm101_vm0, %v83_v13 }
  0x35   :  { %2718 = vmatprep.mubr.msk.f32.mxu0 %vm101_vm0, %v52_v8  ;;  %2766 = vmatprep.mubr.msk.f32.mxu1 %vm101_vm0, %v84_v14 }
  0x38   :  { %2719 = vmatmul.mubr.msk.f32.gmra.mrb[24].mxu0 %vm101_vm0, %v53_v11  ;;  %2767 = vmatmul.mubr.msk.f32.gmra.mrb[24].mxu1 %vm101_vm0, %v85_v17 }
  0x39   :  { %2721 = vmatprep.mubr.msk.f32.mxu0 %vm101_vm0, %v54_v12  ;;  %2769 = vmatprep.mubr.msk.f32.mxu1 %vm101_vm0, %v86_v18 }
  0x3c   :  { %2722 = vmatmul.mubr.msk.f32.gmra.mrb[26].mxu0 %vm101_vm0, %v55_v15  ;;  %2770 = vmatmul.mubr.msk.f32.gmra.mrb[26].mxu1 %vm101_vm0, %v87_v21 }
  0x3d   :  { %2724 = vmatprep.mubr.msk.f32.mxu0 %vm101_vm0, %v56_v16  ;;  %2772 = vmatprep.mubr.msk.f32.mxu1 %vm101_vm0, %v88_v22 }
  0x40   :  { %2725 = vmatmul.mubr.msk.f32.gmra.mrb[28].mxu0 %vm101_vm0, %v57_v19  ;;  %2773 = vmatmul.mubr.msk.f32.gmra.mrb[28].mxu1 %vm101_vm0, %v89_v24 }
  0x41   :  { %2727 = vmatprep.mubr.msk.f32.mxu0 %vm101_vm0, %v58_v20  ;;  %2775 = vmatprep.mubr.msk.f32.mxu1 %vm101_vm0, %v90_v25 }
  0x44   :  { %2728 = vmatmul.mubr.msk.f32.gmra.mrb[30].mxu0 %vm101_vm0, %v59_v23  ;;  %2776 = vmatmul.mubr.msk.f32.gmra.mrb[30].mxu1 %vm101_vm0, %v91_v26 }
  0xdb   :  { %v2684_v28 = vpop.f32.mrb[0].mxu0  ;;  %v3578_v43 = vpop.f32.mrb[0].mxu1 }
  0xdc   :  { %v366_v29 = vadd.f32 %v2684_v28, %v3560_v27  ;;  %v360_v30 = vpop.f32.mrb[1].mxu0  ;;  %v3586_v47 = vpop.f32.mrb[1].mxu1 }
  0xdd   :  { %v361_v31 = vadd.f32 %v3560_v27, %v360_v30 }
  0xde   :  { %v680_v37 = vmax.f32 %v366_v29, 0.0 }
  0xdf   :  { %v679_v32 = vmax.f32 %v361_v31, 0.0  ;;  %v2687_v33 = vpop.f32.mrb[2].mxu0  ;;  %v3590_v55 = vpop.f32.mrb[2].mxu1 }
  0xe0   :  { %v376_v38 = vadd.f32 %v2687_v33, %v3560_v27  ;;  %v370_v39 = vpop.f32.mrb[3].mxu0  ;;  %v3598_v59 = vpop.f32.mrb[3].mxu1 }
  0xe1   :  { %v371_v42 = vadd.f32 %v3560_v27, %v370_v39  ;;  %2810 = vmatprep.mubr.f32.mxu1 %v679_v32 }
  0xe2   :  { %2811 = vmatmul.mubr.f32.vlgmr.msra.gmra.mrb[32].mxu1 %v680_v37  ;;  %v682_v50 = vmax.f32 %v376_v38, 0.0 }
  0xe3   :  { %v681_v48 = vmax.f32 %v371_v42, 0.0  ;;  %v2690_v49 = vpop.f32.mrb[4].mxu0  ;;  %v3602_v2 = vpop.f32.mrb[4].mxu1 }
  0xe4   :  { %v386_v51 = vadd.f32 %v2690_v49, %v3560_v27  ;;  %v380_v52 = vpop.f32.mrb[5].mxu0  ;;  %v3604_v4 = vpop.f32.mrb[5].mxu1 }
  0xe5   :  { %v381_v54 = vadd.f32 %v3560_v27, %v380_v52  ;;  %2813 = vmatprep.mubr.f32.mxu1 %v681_v48 }
  0xe6   :  { %v684_v58 = vmax.f32 %v386_v51, 0.0  ;;  %2814 = vmatmul.mubr.f32.gmra.mrb[34].mxu1 %v682_v50 }
  0xe7   :  { %v683_v60 = vmax.f32 %v381_v54, 0.0  ;;  %v2693_v61 = vpop.f32.mrb[6].mxu0  ;;  %v3608_v10 = vpop.f32.mrb[6].mxu1 }
  0xe8   :  { %v396_v62 = vadd.f32 %v2693_v61, %v3560_v27  ;;  %v390_v63 = vpop.f32.mrb[7].mxu0  ;;  %v3610_v12 = vpop.f32.mrb[7].mxu1 }
  0xe9   :  { %v391_v1 = vadd.f32 %v3560_v27, %v390_v63  ;;  %2816 = vmatprep.mubr.f32.mxu1 %v683_v60 }
  0xea   :  { %v686_v3 = vmax.f32 %v396_v62, 0.0  ;;  %2817 = vmatmul.mubr.f32.gmra.mrb[36].mxu1 %v684_v58 }
  0xeb   :  { %v685_v5 = vmax.f32 %v391_v1, 0.0  ;;  %v2696_v6 = vpop.f32.mrb[8].mxu0  ;;  %v3614_v18 = vpop.f32.mrb[8].mxu1 }
  0xec   :  { %v406_v7 = vadd.f32 %v2696_v6, %v3560_v27  ;;  %v400_v8 = vpop.f32.mrb[9].mxu0  ;;  %v3616_v20 = vpop.f32.mrb[9].mxu1 }
  0xed   :  { %v401_v9 = vadd.f32 %v3560_v27, %v400_v8  ;;  %2819 = vmatprep.mubr.f32.mxu1 %v685_v5 }
  0xee   :  { %v688_v11 = vmax.f32 %v406_v7, 0.0  ;;  %2820 = vmatmul.mubr.f32.gmra.mrb[38].mxu1 %v686_v3 }
  0xef   :  { %v687_v13 = vmax.f32 %v401_v9, 0.0  ;;  %v2699_v14 = vpop.f32.mrb[10].mxu0  ;;  %v3620_v26 = vpop.f32.mrb[10].mxu1 }
  0xf0   :  { %v416_v15 = vadd.f32 %v2699_v14, %v3560_v27  ;;  %v410_v16 = vpop.f32.mrb[11].mxu0  ;;  %v3622_v29 = vpop.f32.mrb[11].mxu1 }
  0xf1   :  { %v411_v17 = vadd.f32 %v3560_v27, %v410_v16  ;;  %2822 = vmatprep.mubr.f32.mxu1 %v687_v13 }
  0xf2   :  { %v690_v19 = vmax.f32 %v416_v15, 0.0  ;;  %2823 = vmatmul.mubr.f32.gmra.mrb[40].mxu1 %v688_v11 }
  0xf3   :  { %v689_v21 = vmax.f32 %v411_v17, 0.0  ;;  %v2702_v22 = vpop.f32.mrb[12].mxu0  ;;  %v3626_v35 = vpop.f32.mrb[12].mxu1 }
  0xf4   :  { %v426_v23 = vadd.f32 %v2702_v22, %v3560_v27  ;;  %v420_v24 = vpop.f32.mrb[13].mxu0  ;;  %v3628_v37 = vpop.f32.mrb[13].mxu1 }
  0xf5   :  { %v421_v25 = vadd.f32 %v3560_v27, %v420_v24  ;;  %2825 = vmatprep.mubr.f32.mxu1 %v689_v21 }
  0xf6   :  { %v692_v28 = vmax.f32 %v426_v23, 0.0  ;;  %2826 = vmatmul.mubr.f32.gmra.mrb[42].mxu1 %v690_v19 }
  0xf7   :  { %v691_v30 = vmax.f32 %v421_v25, 0.0  ;;  %v2705_v31 = vpop.f32.mrb[14].mxu0  ;;  %v3632_v44 = vpop.f32.mrb[14].mxu1 }
  0xf8   :  { %v436_v32 = vadd.f32 %v2705_v31, %v3560_v27  ;;  %v430_v33 = vpop.f32.mrb[15].mxu0  ;;  %v3634_v46 = vpop.f32.mrb[15].mxu1 }
  0xf9   :  { %v431_v34 = vadd.f32 %v3560_v27, %v430_v33  ;;  %2828 = vmatprep.mubr.f32.mxu1 %v691_v30 }
  0xfa   :  { %v694_v36 = vmax.f32 %v436_v32, 0.0  ;;  %2829 = vmatmul.mubr.f32.gmra.mrb[44].mxu1 %v692_v28 }
  0xfb   :  { %v693_v38 = vmax.f32 %v431_v34, 0.0  ;;  %v2708_v39 = vpop.f32.mrb[16].mxu0  ;;  %v3638_v53 = vpop.f32.mrb[16].mxu1 }
  0xfc   :  { %v446_v40 = vadd.f32 %v2708_v39, %v3560_v27  ;;  %v440_v41 = vpop.f32.mrb[17].mxu0  ;;  %v3640_v56 = vpop.f32.mrb[17].mxu1 }
  0xfd   :  { %v441_v42 = vadd.f32 %v3560_v27, %v440_v41  ;;  %2831 = vmatprep.mubr.f32.mxu1 %v693_v38 }
  0xfe   :  { %v696_v45 = vmax.f32 %v446_v40, 0.0  ;;  %2832 = vmatmul.mubr.f32.gmra.mrb[46].mxu1 %v694_v36 }
  0xff   :  { %v695_v48 = vmax.f32 %v441_v42, 0.0  ;;  %v2711_v49 = vpop.f32.mrb[18].mxu0  ;;  %v3644_v63 = vpop.f32.mrb[18].mxu1 }
 0x100   :  { %v456_v50 = vadd.f32 %v2711_v49, %v3560_v27  ;;  %v450_v51 = vpop.f32.mrb[19].mxu0  ;;  %v3646_v1 = vpop.f32.mrb[19].mxu1 }
 0x101   :  { %v451_v52 = vadd.f32 %v3560_v27, %v450_v51  ;;  %2834 = vmatprep.mubr.f32.mxu1 %v695_v48  ;;  %v521_v51 = vadd.f32 %v3560_v27, %v3586_v47  ;;  %v531_v47 = vadd.f32 %v3560_v27, %v3598_v59  ;;  %v546_v59 = vadd.f32 %v3602_v2, %v3560_v27 }
 0x102   :  { %v698_v54 = vmax.f32 %v456_v50, 0.0  ;;  %2835 = vmatmul.mubr.f32.gmra.mrb[48].mxu1 %v696_v45  ;;  %v566_v2 = vadd.f32 %v3614_v18, %v3560_v27  ;;  %v586_v18 = vadd.f32 %v3626_v35, %v3560_v27  ;;  %v606_v35 = vadd.f32 %v3638_v53, %v3560_v27 }
 0x103   :  { %v697_v57 = vmax.f32 %v451_v52, 0.0  ;;  %v2714_v58 = vpop.f32.mrb[20].mxu0  ;;  %v3650_v9 = vpop.f32.mrb[20].mxu1 }
 0x104   :  { %v466_v60 = vadd.f32 %v2714_v58, %v3560_v27  ;;  %v460_v61 = vpop.f32.mrb[21].mxu0  ;;  %v3652_v13 = vpop.f32.mrb[21].mxu1  ;;  %v626_v53 = vadd.f32 %v3650_v9, %v3560_v27 }
 0x105   :  { %v461_v62 = vadd.f32 %v3560_v27, %v460_v61  ;;  %2837 = vmatprep.mubr.f32.mxu1 %v697_v57  ;;  %v526_v61 = vadd.f32 %v3578_v43, %v3560_v27  ;;  %v541_v43 = vadd.f32 %v3560_v27, %v3604_v4  ;;  %v561_v4 = vadd.f32 %v3560_v27, %v3616_v20 }
 0x106   :  { %v700_v0 = vmax.f32 %v466_v60, 0.0  ;;  %2838 = vmatmul.mubr.f32.gmra.mrb[50].mxu1 %v698_v54  ;;  %v581_v20 = vadd.f32 %v3560_v27, %v3628_v37  ;;  %v601_v37 = vadd.f32 %v3560_v27, %v3640_v56  ;;  %v621_v56 = vadd.f32 %v3560_v27, %v3652_v13 }
 0x107   :  { %v699_v3 = vmax.f32 %v461_v62, 0.0  ;;  %v2717_v5 = vpop.f32.mrb[22].mxu0  ;;  %v3656_v21 = vpop.f32.mrb[22].mxu1 }
 0x108   :  { %v476_v6 = vadd.f32 %v2717_v5, %v3560_v27  ;;  %v470_v7 = vpop.f32.mrb[23].mxu0  ;;  %v3658_v23 = vpop.f32.mrb[23].mxu1 }
 0x109   :  { %v471_v8 = vadd.f32 %v3560_v27, %v470_v7  ;;  %2840 = vmatprep.mubr.f32.mxu1 %v699_v3  ;;  %v711_v3 = vmax.f32 %v521_v51, 0.0  ;;  %v536_v7 = vadd.f32 %v3590_v55, %v3560_v27  ;;  %v556_v55 = vadd.f32 %v3608_v10, %v3560_v27 }
 0x10a   :  { %v702_v11 = vmax.f32 %v476_v6, 0.0  ;;  %2841 = vmatmul.mubr.f32.gmra.mrb[52].mxu1 %v700_v0  ;;  %v712_v6 = vmax.f32 %v526_v61, 0.0  ;;  %v576_v10 = vadd.f32 %v3620_v26, %v3560_v27  ;;  %v596_v26 = vadd.f32 %v3632_v44, %v3560_v27 }
 0x10b   :  { %v701_v14 = vmax.f32 %v471_v8, 0.0  ;;  %v2720_v15 = vpop.f32.mrb[24].mxu0  ;;  %v3662_v32 = vpop.f32.mrb[24].mxu1  ;;  %v616_v44 = vadd.f32 %v3644_v63, %v3560_v27  ;;  %v636_v63 = vadd.f32 %v3656_v21, %v3560_v27 }
 0x10c   :  { %v486_v16 = vadd.f32 %v2720_v15, %v3560_v27  ;;  %v480_v17 = vpop.f32.mrb[25].mxu0  ;;  %v3664_v34 = vpop.f32.mrb[25].mxu1  ;;  %v715_v15 = vmax.f32 %v541_v43, 0.0  ;;  %v646_v9 = vadd.f32 %v3662_v32, %v3560_v27 }
 0x10d   :  { %v481_v19 = vadd.f32 %v3560_v27, %v480_v17  ;;  %2843 = vmatprep.mubr.f32.mxu1 %v701_v14  ;;  %v714_v14 = vmax.f32 %v536_v7, 0.0  ;;  %v716_v17 = vmax.f32 %v546_v59, 0.0  ;;  %v641_v13 = vadd.f32 %v3560_v27, %v3664_v34 }
 0x10e   :  { %v704_v22 = vmax.f32 %v486_v16, 0.0  ;;  %2844 = vmatmul.mubr.f32.gmra.mrb[54].mxu1 %v702_v11  ;;  %v713_v11 = vmax.f32 %v531_v47, 0.0  ;;  %v551_v16 = vadd.f32 %v3560_v27, %v3610_v12  ;;  %v571_v12 = vadd.f32 %v3560_v27, %v3622_v29 }
 0x10f   :  { %v703_v24 = vmax.f32 %v481_v19, 0.0  ;;  %v2723_v25 = vpop.f32.mrb[26].mxu0  ;;  %v3668_v42 = vpop.f32.mrb[26].mxu1  ;;  %v591_v29 = vadd.f32 %v3560_v27, %v3634_v46  ;;  %v611_v46 = vadd.f32 %v3560_v27, %v3646_v1  ;;  %v631_v1 = vadd.f32 %v3560_v27, %v3658_v23 }
 0x110   :  { %v496_v28 = vadd.f32 %v2723_v25, %v3560_v27  ;;  %v490_v30 = vpop.f32.mrb[27].mxu0  ;;  %v3670_v48 = vpop.f32.mrb[27].mxu1  ;;  %v717_v19 = vmax.f32 %v551_v16, 0.0  ;;  %v720_v25 = vmax.f32 %v566_v2, 0.0  ;;  %v656_v21 = vadd.f32 %v3668_v42, %v3560_v27 }
 0x111   :  { %v491_v31 = vadd.f32 %v3560_v27, %v490_v30  ;;  %2846 = vmatprep.mubr.f32.mxu1 %v703_v24  ;;  %v719_v24 = vmax.f32 %v561_v4, 0.0  ;;  %v722_v30 = vmax.f32 %v576_v10, 0.0  ;;  %v733_v51 = vmax.f32 %v631_v1, 0.0 }
 0x112   :  { %v706_v33 = vmax.f32 %v496_v28, 0.0  ;;  %2847 = vmatmul.mubr.f32.gmra.mrb[56].mxu1 %v704_v22  ;;  %v718_v22 = vmax.f32 %v556_v55, 0.0  ;;  %v721_v28 = vmax.f32 %v571_v12, 0.0  ;;  %v651_v23 = vadd.f32 %v3560_v27, %v3670_v48 }
 0x113   :  { %v705_v36 = vmax.f32 %v491_v31, 0.0  ;;  %v2726_v38 = vpop.f32.mrb[28].mxu0  ;;  %v3676_v58 = vpop.f32.mrb[28].mxu1  ;;  %v723_v31 = vmax.f32 %v581_v20, 0.0  ;;  %v738_v61 = vmax.f32 %v656_v21, 0.0 }
 0x114   :  { %v506_v39 = vadd.f32 %v2726_v38, %v3560_v27  ;;  %v500_v40 = vpop.f32.mrb[29].mxu0  ;;  %v3680_v62 = vpop.f32.mrb[29].mxu1  ;;  %v726_v38 = vmax.f32 %v596_v26, 0.0  ;;  %v666_v32 = vadd.f32 %v3676_v58, %v3560_v27  ;;  %v3749_v58 = vld [vmem:[%s4529_s4] ss:$0 sm:$0xff] }
 0x115   :  { %v501_v41 = vadd.f32 %v3560_v27, %v500_v40  ;;  %2849 = vmatprep.mubr.f32.mxu1 %v705_v36  ;;  %v725_v36 = vmax.f32 %v591_v29, 0.0  ;;  %v728_v40 = vmax.f32 %v606_v35, 0.0  ;;  %v661_v34 = vadd.f32 %v3560_v27, %v3680_v62 }
 0x116   :  { %v708_v45 = vmax.f32 %v506_v39, 0.0  ;;  %2850 = vmatmul.mubr.f32.gmra.mrb[58].mxu1 %v706_v33  ;;  %v724_v33 = vmax.f32 %v586_v18, 0.0  ;;  %v727_v39 = vmax.f32 %v601_v37, 0.0 }
 0x117   :  { %v707_v49 = vmax.f32 %v501_v41, 0.0  ;;  %v2729_v50 = vpop.f32.mrb[30].mxu0  ;;  %v3684_v5 = vpop.f32.mrb[30].mxu1  ;;  %v729_v41 = vmax.f32 %v611_v46, 0.0 }
 0x118   :  { %v516_v52 = vadd.f32 %v2729_v50, %v3560_v27  ;;  %v510_v54 = vpop.f32.mrb[31].mxu0  ;;  %v3688_v8 = vpop.f32.mrb[31].mxu1  ;;  %v732_v50 = vmax.f32 %v626_v53, 0.0  ;;  %v676_v42 = vadd.f32 %v3684_v5, %v3560_v27 }
 0x119   :  { %v511_v57 = vadd.f32 %v3560_v27, %v510_v54  ;;  %2852 = vmatprep.mubr.f32.mxu1 %v707_v49  ;;  %v731_v49 = vmax.f32 %v621_v56, 0.0  ;;  %v735_v54 = vmax.f32 %v641_v13, 0.0  ;;  %v671_v48 = vadd.f32 %v3560_v27, %v3688_v8 }
 0x11a   :  { %v710_v60 = vmax.f32 %v516_v52, 0.0  ;;  %2853 = vmatmul.mubr.f32.gmra.mrb[60].mxu1 %v708_v45  ;;  %v730_v45 = vmax.f32 %v616_v44, 0.0  ;;  %v734_v52 = vmax.f32 %v636_v63, 0.0 }
 0x11b   :  { %v709_v0 = vmax.f32 %v511_v57, 0.0  ;;  %v736_v57 = vmax.f32 %v646_v9, 0.0  ;;  %v741_v47 = vmax.f32 %v671_v48, 0.0 }
 0x11d   :  { %2855 = vmatprep.mubr.f32.mxu1 %v709_v0  ;;  %v739_v0 = vmax.f32 %v661_v34, 0.0 }
 0x11e   :  { %2856 = vmatmul.mubr.f32.gmra.mrb[62].mxu1 %v710_v60  ;;  %v737_v60 = vmax.f32 %v651_v23, 0.0 }
 0x11f   :  { %2858 = vmatprep.mubr.f32.mxu1 %v711_v3  ;;  %v740_v3 = vmax.f32 %v666_v32, 0.0 }
 0x122   :  { %2859 = vmatmul.mubr.f32.gmra.mrb[64].mxu1 %v712_v6  ;;  %v742_v6 = vmax.f32 %v676_v42, 0.0 }
 0x123   :  { %2861 = vmatprep.mubr.f32.mxu1 %v713_v11 }
 0x126   :  { %2862 = vmatmul.mubr.f32.gmra.mrb[66].mxu1 %v714_v14 }
 0x127   :  { %2864 = vmatprep.mubr.f32.mxu1 %v715_v15 }
 0x12a   :  { %2865 = vmatmul.mubr.f32.gmra.mrb[68].mxu1 %v716_v17 }
 0x12b   :  { %2867 = vmatprep.mubr.f32.mxu1 %v717_v19 }
 0x12e   :  { %2868 = vmatmul.mubr.f32.gmra.mrb[70].mxu1 %v718_v22 }
 0x12f   :  { %2870 = vmatprep.mubr.f32.mxu1 %v719_v24 }
 0x132   :  { %2871 = vmatmul.mubr.f32.gmra.mrb[72].mxu1 %v720_v25 }
 0x133   :  { %2873 = vmatprep.mubr.f32.mxu1 %v721_v28 }
 0x136   :  { %2874 = vmatmul.mubr.f32.gmra.mrb[74].mxu1 %v722_v30 }
 0x137   :  { %2876 = vmatprep.mubr.f32.mxu1 %v723_v31 }
 0x13a   :  { %2877 = vmatmul.mubr.f32.gmra.mrb[76].mxu1 %v724_v33 }
 0x13b   :  { %2879 = vmatprep.mubr.f32.mxu1 %v725_v36 }
 0x13e   :  { %2880 = vmatmul.mubr.f32.gmra.mrb[78].mxu1 %v726_v38 }
 0x13f   :  { %2882 = vmatprep.mubr.f32.mxu1 %v727_v39 }
 0x142   :  { %2883 = vmatmul.mubr.f32.gmra.mrb[80].mxu1 %v728_v40 }
 0x143   :  { %2885 = vmatprep.mubr.f32.mxu1 %v729_v41 }
 0x146   :  { %2886 = vmatmul.mubr.f32.gmra.mrb[82].mxu1 %v730_v45 }
 0x147   :  { %2888 = vmatprep.mubr.f32.mxu1 %v731_v49 }
 0x14a   :  { %2889 = vmatmul.mubr.f32.gmra.mrb[84].mxu1 %v732_v50 }
 0x14b   :  { %2891 = vmatprep.mubr.f32.mxu1 %v733_v51 }
 0x14e   :  { %2892 = vmatmul.mubr.f32.gmra.mrb[86].mxu1 %v734_v52 }
 0x14f   :  { %2894 = vmatprep.mubr.f32.mxu1 %v735_v54 }
 0x152   :  { %2895 = vmatmul.mubr.f32.gmra.mrb[88].mxu1 %v736_v57 }
 0x153   :  { %2897 = vmatprep.mubr.f32.mxu1 %v737_v60 }
 0x156   :  { %2898 = vmatmul.mubr.f32.gmra.mrb[90].mxu1 %v738_v61 }
 0x157   :  { %2900 = vmatprep.mubr.f32.mxu1 %v739_v0 }
 0x15a   :  { %2901 = vmatmul.mubr.f32.gmra.mrb[92].mxu1 %v740_v3 }
 0x15b   :  { %2903 = vmatprep.mubr.f32.mxu1 %v741_v47 }
 0x15e   :  { %2904 = vmatmul.mubr.f32.gmra.mrb[94].mxu1 %v742_v6 }
 0x1b5   :  { %v2812_v62 = vpop.f32.mrb[32].mxu1 }
 0x1b6   :  { %v838_v7 = vadd.f32 %v2812_v62, %v3749_v58  ;;  %v832_v8 = vpop.f32.mrb[33].mxu1 }
 0x1b7   :  { %v833_v11 = vadd.f32 %v3749_v58, %v832_v8 }
 0x1b8   :  { %v1152_v5 = vmax.f32 %v838_v7, 0.0 }
 0x1b9   :  { %v1151_v43 = vmax.f32 %v833_v11, 0.0  ;;  %v2815_v27 = vpop.f32.mrb[34].mxu1 }
 0x1ba   :  { %v848_v14 = vadd.f32 %v2815_v27, %v3749_v58  ;;  %v842_v59 = vpop.f32.mrb[35].mxu1 }
 0x1bb   :  { %v843_v15 = vadd.f32 %v3749_v58, %v842_v59  ;;  %2922 = vmatprep.mubr.msk.f32.mxu0 %vm1230_vm1, %v1151_v43 }
 0x1bc   :  { %2923 = vmatmul.mubr.msk.f32.vlgmr.msra.gmra.mrb[32].mxu0 %vm1230_vm1, %v1152_v5  ;;  %v1154_v55 = vmax.f32 %v848_v14, 0.0 }
 0x1bd   :  { %v1153_v16 = vmax.f32 %v843_v15, 0.0  ;;  %v2818_v17 = vpop.f32.mrb[36].mxu1 }
 0x1be   :  { %v858_v19 = vadd.f32 %v2818_v17, %v3749_v58  ;;  %v852_v4 = vpop.f32.mrb[37].mxu1 }
 0x1bf   :  { %v853_v22 = vadd.f32 %v3749_v58, %v852_v4  ;;  %2925 = vmatprep.mubr.msk.f32.mxu0 %vm1230_vm1, %v1153_v16 }
 0x1c0   :  { %v1156_v2 = vmax.f32 %v858_v19, 0.0  ;;  %2926 = vmatmul.mubr.msk.f32.gmra.mrb[34].mxu0 %vm1230_vm1, %v1154_v55 }
 0x1c1   :  { %v1155_v24 = vmax.f32 %v853_v22, 0.0  ;;  %v2821_v12 = vpop.f32.mrb[38].mxu1 }
 0x1c2   :  { %v868_v25 = vadd.f32 %v2821_v12, %v3749_v58  ;;  %v862_v10 = vpop.f32.mrb[39].mxu1 }
 0x1c3   :  { %v863_v28 = vadd.f32 %v3749_v58, %v862_v10  ;;  %2928 = vmatprep.mubr.msk.f32.mxu0 %vm1230_vm1, %v1155_v24 }
 0x1c4   :  { %v1158_v20 = vmax.f32 %v868_v25, 0.0  ;;  %2929 = vmatmul.mubr.msk.f32.gmra.mrb[36].mxu0 %vm1230_vm1, %v1156_v2 }
 0x1c5   :  { %v1157_v30 = vmax.f32 %v863_v28, 0.0  ;;  %v2824_v18 = vpop.f32.mrb[40].mxu1 }
 0x1c6   :  { %v878_v31 = vadd.f32 %v2824_v18, %v3749_v58  ;;  %v872_v29 = vpop.f32.mrb[41].mxu1 }
 0x1c7   :  { %v873_v33 = vadd.f32 %v3749_v58, %v872_v29  ;;  %2931 = vmatprep.mubr.msk.f32.mxu0 %vm1230_vm1, %v1157_v30 }
 0x1c8   :  { %v1160_v26 = vmax.f32 %v878_v31, 0.0  ;;  %2932 = vmatmul.mubr.msk.f32.gmra.mrb[38].mxu0 %vm1230_vm1, %v1158_v20 }
 0x1c9   :  { %v1159_v36 = vmax.f32 %v873_v33, 0.0  ;;  %v2827_v37 = vpop.f32.mrb[42].mxu1 }
 0x1ca   :  { %v888_v38 = vadd.f32 %v2827_v37, %v3749_v58  ;;  %v882_v35 = vpop.f32.mrb[43].mxu1 }
 0x1cb   :  { %v883_v39 = vadd.f32 %v3749_v58, %v882_v35  ;;  %2934 = vmatprep.mubr.msk.f32.mxu0 %vm1230_vm1, %v1159_v36 }
 0x1cc   :  { %v1162_v46 = vmax.f32 %v888_v38, 0.0  ;;  %2935 = vmatmul.mubr.msk.f32.gmra.mrb[40].mxu0 %vm1230_vm1, %v1160_v26 }
 0x1cd   :  { %v1161_v40 = vmax.f32 %v883_v39, 0.0  ;;  %v2830_v44 = vpop.f32.mrb[44].mxu1 }
 0x1ce   :  { %v898_v41 = vadd.f32 %v2830_v44, %v3749_v58  ;;  %v892_v56 = vpop.f32.mrb[45].mxu1 }
 0x1cf   :  { %v893_v45 = vadd.f32 %v3749_v58, %v892_v56  ;;  %2937 = vmatprep.mubr.msk.f32.mxu0 %vm1230_vm1, %v1161_v40 }
 0x1d0   :  { %v1164_v53 = vmax.f32 %v898_v41, 0.0  ;;  %2938 = vmatmul.mubr.msk.f32.gmra.mrb[42].mxu0 %vm1230_vm1, %v1162_v46 }
 0x1d1   :  { %v1163_v49 = vmax.f32 %v893_v45, 0.0  ;;  %v2833_v1 = vpop.f32.mrb[46].mxu1 }
 0x1d2   :  { %v908_v50 = vadd.f32 %v2833_v1, %v3749_v58  ;;  %v902_v63 = vpop.f32.mrb[47].mxu1 }
 0x1d3   :  { %v903_v51 = vadd.f32 %v3749_v58, %v902_v63  ;;  %2940 = vmatprep.mubr.msk.f32.mxu0 %vm1230_vm1, %v1163_v49 }
 0x1d4   :  { %v1166_v13 = vmax.f32 %v908_v50, 0.0  ;;  %2941 = vmatmul.mubr.msk.f32.gmra.mrb[44].mxu0 %vm1230_vm1, %v1164_v53 }
 0x1d5   :  { %v1165_v52 = vmax.f32 %v903_v51, 0.0  ;;  %v2836_v9 = vpop.f32.mrb[48].mxu1 }
 0x1d6   :  { %v918_v54 = vadd.f32 %v2836_v9, %v3749_v58  ;;  %v912_v23 = vpop.f32.mrb[49].mxu1 }
 0x1d7   :  { %v913_v57 = vadd.f32 %v3749_v58, %v912_v23  ;;  %2943 = vmatprep.mubr.msk.f32.mxu0 %vm1230_vm1, %v1165_v52 }
 0x1d8   :  { %v1168_v21 = vmax.f32 %v918_v54, 0.0  ;;  %2944 = vmatmul.mubr.msk.f32.gmra.mrb[46].mxu0 %vm1230_vm1, %v1166_v13 }
 0x1d9   :  { %v1167_v60 = vmax.f32 %v913_v57, 0.0  ;;  %v2839_v34 = vpop.f32.mrb[50].mxu1 }
 0x1da   :  { %v928_v61 = vadd.f32 %v2839_v34, %v3749_v58  ;;  %v922_v32 = vpop.f32.mrb[51].mxu1 }
 0x1db   :  { %v923_v0 = vadd.f32 %v3749_v58, %v922_v32  ;;  %2946 = vmatprep.mubr.msk.f32.mxu0 %vm1230_vm1, %v1167_v60 }
 0x1dc   :  { %v1170_v48 = vmax.f32 %v928_v61, 0.0  ;;  %2947 = vmatmul.mubr.msk.f32.gmra.mrb[48].mxu0 %vm1230_vm1, %v1168_v21 }
 0x1dd   :  { %v1169_v3 = vmax.f32 %v923_v0, 0.0  ;;  %v2842_v42 = vpop.f32.mrb[52].mxu1 }
 0x1de   :  { %v938_v47 = vadd.f32 %v2842_v42, %v3749_v58  ;;  %v932_v6 = vpop.f32.mrb[53].mxu1 }
 0x1df   :  { %v933_v62 = vadd.f32 %v3749_v58, %v932_v6  ;;  %2949 = vmatprep.mubr.msk.f32.mxu0 %vm1230_vm1, %v1169_v3 }
 0x1e0   :  { %v1172_v7 = vmax.f32 %v938_v47, 0.0  ;;  %2950 = vmatmul.mubr.msk.f32.gmra.mrb[50].mxu0 %vm1230_vm1, %v1170_v48 }
 0x1e1   :  { %v1171_v8 = vmax.f32 %v933_v62, 0.0  ;;  %v2845_v11 = vpop.f32.mrb[54].mxu1 }
 0x1e2   :  { %v948_v43 = vadd.f32 %v2845_v11, %v3749_v58  ;;  %v942_v27 = vpop.f32.mrb[55].mxu1 }
 0x1e3   :  { %v943_v5 = vadd.f32 %v3749_v58, %v942_v27  ;;  %2952 = vmatprep.mubr.msk.f32.mxu0 %vm1230_vm1, %v1171_v8 }
 0x1e4   :  { %v1174_v14 = vmax.f32 %v948_v43, 0.0  ;;  %2953 = vmatmul.mubr.msk.f32.gmra.mrb[52].mxu0 %vm1230_vm1, %v1172_v7 }
 0x1e5   :  { %v1173_v59 = vmax.f32 %v943_v5, 0.0  ;;  %v2848_v15 = vpop.f32.mrb[56].mxu1 }
 0x1e6   :  { %v958_v16 = vadd.f32 %v2848_v15, %v3749_v58  ;;  %v952_v17 = vpop.f32.mrb[57].mxu1 }
 0x1e7   :  { %v953_v55 = vadd.f32 %v3749_v58, %v952_v17  ;;  %2955 = vmatprep.mubr.msk.f32.mxu0 %vm1230_vm1, %v1173_v59 }
 0x1e8   :  { %v1176_v19 = vmax.f32 %v958_v16, 0.0  ;;  %2956 = vmatmul.mubr.msk.f32.gmra.mrb[54].mxu0 %vm1230_vm1, %v1174_v14 }
 0x1e9   :  { %v1175_v4 = vmax.f32 %v953_v55, 0.0  ;;  %v2851_v22 = vpop.f32.mrb[58].mxu1 }
 0x1ea   :  { %v968_v2 = vadd.f32 %v2851_v22, %v3749_v58  ;;  %v962_v24 = vpop.f32.mrb[59].mxu1 }
 0x1eb   :  { %v963_v12 = vadd.f32 %v3749_v58, %v962_v24  ;;  %2958 = vmatprep.mubr.msk.f32.mxu0 %vm1230_vm1, %v1175_v4 }
 0x1ec   :  { %v1178_v25 = vmax.f32 %v968_v2, 0.0  ;;  %2959 = vmatmul.mubr.msk.f32.gmra.mrb[56].mxu0 %vm1230_vm1, %v1176_v19 }
 0x1ed   :  { %v1177_v10 = vmax.f32 %v963_v12, 0.0  ;;  %v2854_v28 = vpop.f32.mrb[60].mxu1 }
 0x1ee   :  { %v978_v20 = vadd.f32 %v2854_v28, %v3749_v58  ;;  %v972_v30 = vpop.f32.mrb[61].mxu1 }
 0x1ef   :  { %v973_v18 = vadd.f32 %v3749_v58, %v972_v30  ;;  %2961 = vmatprep.mubr.msk.f32.mxu0 %vm1230_vm1, %v1177_v10 }
 0x1f0   :  { %v1180_v31 = vmax.f32 %v978_v20, 0.0  ;;  %2962 = vmatmul.mubr.msk.f32.gmra.mrb[58].mxu0 %vm1230_vm1, %v1178_v25 }
 0x1f1   :  { %v1179_v29 = vmax.f32 %v973_v18, 0.0  ;;  %v2857_v33 = vpop.f32.mrb[62].mxu1 }
 0x1f2   :  { %v988_v26 = vadd.f32 %v2857_v33, %v3749_v58  ;;  %v982_v36 = vpop.f32.mrb[63].mxu1 }
 0x1f3   :  { %v983_v37 = vadd.f32 %v3749_v58, %v982_v36  ;;  %2964 = vmatprep.mubr.msk.f32.mxu0 %vm1230_vm1, %v1179_v29 }
 0x1f4   :  { %v1182_v38 = vmax.f32 %v988_v26, 0.0  ;;  %2965 = vmatmul.mubr.msk.f32.gmra.mrb[60].mxu0 %vm1230_vm1, %v1180_v31 }
 0x1f5   :  { %v1181_v35 = vmax.f32 %v983_v37, 0.0  ;;  %v2860_v39 = vpop.f32.mrb[64].mxu1 }
 0x1f6   :  { %v998_v46 = vadd.f32 %v2860_v39, %v3749_v58  ;;  %v992_v40 = vpop.f32.mrb[65].mxu1 }
 0x1f7   :  { %v993_v44 = vadd.f32 %v3749_v58, %v992_v40  ;;  %2967 = vmatprep.mubr.msk.f32.mxu0 %vm1230_vm1, %v1181_v35 }
 0x1f8   :  { %v1184_v41 = vmax.f32 %v998_v46, 0.0  ;;  %2968 = vmatmul.mubr.msk.f32.gmra.mrb[62].mxu0 %vm1230_vm1, %v1182_v38 }
 0x1f9   :  { %v1183_v56 = vmax.f32 %v993_v44, 0.0  ;;  %v2863_v45 = vpop.f32.mrb[66].mxu1 }
 0x1fa   :  { %v1008_v53 = vadd.f32 %v2863_v45, %v3749_v58  ;;  %v1002_v49 = vpop.f32.mrb[67].mxu1 }
 0x1fb   :  { %v1003_v1 = vadd.f32 %v3749_v58, %v1002_v49  ;;  %2970 = vmatprep.mubr.msk.f32.mxu0 %vm1230_vm1, %v1183_v56 }
 0x1fc   :  { %v1186_v50 = vmax.f32 %v1008_v53, 0.0  ;;  %2971 = vmatmul.mubr.msk.f32.gmra.mrb[64].mxu0 %vm1230_vm1, %v1184_v41 }
 0x1fd   :  { %v1185_v63 = vmax.f32 %v1003_v1, 0.0  ;;  %v2866_v51 = vpop.f32.mrb[68].mxu1 }
 0x1fe   :  { %v1018_v13 = vadd.f32 %v2866_v51, %v3749_v58  ;;  %v1012_v52 = vpop.f32.mrb[69].mxu1 }
 0x1ff   :  { %v1013_v9 = vadd.f32 %v3749_v58, %v1012_v52  ;;  %2973 = vmatprep.mubr.msk.f32.mxu0 %vm1230_vm1, %v1185_v63 }
 0x200   :  { %v1188_v54 = vmax.f32 %v1018_v13, 0.0  ;;  %2974 = vmatmul.mubr.msk.f32.gmra.mrb[66].mxu0 %vm1230_vm1, %v1186_v50 }
 0x201   :  { %v1187_v23 = vmax.f32 %v1013_v9, 0.0  ;;  %v2869_v57 = vpop.f32.mrb[70].mxu1 }
 0x202   :  { %v1028_v21 = vadd.f32 %v2869_v57, %v3749_v58  ;;  %v1022_v60 = vpop.f32.mrb[71].mxu1 }
 0x203   :  { %v1023_v34 = vadd.f32 %v3749_v58, %v1022_v60  ;;  %2976 = vmatprep.mubr.msk.f32.mxu0 %vm1230_vm1, %v1187_v23 }
 0x204   :  { %v1190_v61 = vmax.f32 %v1028_v21, 0.0  ;;  %2977 = vmatmul.mubr.msk.f32.gmra.mrb[68].mxu0 %vm1230_vm1, %v1188_v54 }
 0x205   :  { %v1189_v32 = vmax.f32 %v1023_v34, 0.0  ;;  %v2872_v0 = vpop.f32.mrb[72].mxu1 }
 0x206   :  { %v1038_v48 = vadd.f32 %v2872_v0, %v3749_v58  ;;  %v1032_v3 = vpop.f32.mrb[73].mxu1 }
 0x207   :  { %v1033_v42 = vadd.f32 %v3749_v58, %v1032_v3  ;;  %2979 = vmatprep.mubr.msk.f32.mxu0 %vm1230_vm1, %v1189_v32 }
 0x208   :  { %v1192_v47 = vmax.f32 %v1038_v48, 0.0  ;;  %2980 = vmatmul.mubr.msk.f32.gmra.mrb[70].mxu0 %vm1230_vm1, %v1190_v61 }
 0x209   :  { %v1191_v6 = vmax.f32 %v1033_v42, 0.0  ;;  %v2875_v62 = vpop.f32.mrb[74].mxu1 }
 0x20a   :  { %v1048_v7 = vadd.f32 %v2875_v62, %v3749_v58  ;;  %v1042_v8 = vpop.f32.mrb[75].mxu1 }
 0x20b   :  { %v1043_v11 = vadd.f32 %v3749_v58, %v1042_v8  ;;  %2982 = vmatprep.mubr.msk.f32.mxu0 %vm1230_vm1, %v1191_v6 }
 0x20c   :  { %v1194_v43 = vmax.f32 %v1048_v7, 0.0  ;;  %2983 = vmatmul.mubr.msk.f32.gmra.mrb[72].mxu0 %vm1230_vm1, %v1192_v47 }
 0x20d   :  { %v1193_v27 = vmax.f32 %v1043_v11, 0.0  ;;  %v2878_v5 = vpop.f32.mrb[76].mxu1  ;;  %v3882_v11 = vld [vmem:[%s4530_s6] ss:$0 sm:$0xff] }
 0x20e   :  { %v1058_v14 = vadd.f32 %v2878_v5, %v3749_v58  ;;  %v1052_v59 = vpop.f32.mrb[77].mxu1 }
 0x20f   :  { %v1053_v15 = vadd.f32 %v3749_v58, %v1052_v59  ;;  %2985 = vmatprep.mubr.msk.f32.mxu0 %vm1230_vm1, %v1193_v27 }
 0x210   :  { %v1196_v16 = vmax.f32 %v1058_v14, 0.0  ;;  %2986 = vmatmul.mubr.msk.f32.gmra.mrb[74].mxu0 %vm1230_vm1, %v1194_v43 }
 0x211   :  { %v1195_v17 = vmax.f32 %v1053_v15, 0.0  ;;  %v2881_v55 = vpop.f32.mrb[78].mxu1 }
 0x212   :  { %v1068_v19 = vadd.f32 %v2881_v55, %v3749_v58  ;;  %v1062_v4 = vpop.f32.mrb[79].mxu1 }
 0x213   :  { %v1063_v22 = vadd.f32 %v3749_v58, %v1062_v4  ;;  %2988 = vmatprep.mubr.msk.f32.mxu0 %vm1230_vm1, %v1195_v17 }
 0x214   :  { %v1198_v2 = vmax.f32 %v1068_v19, 0.0  ;;  %2989 = vmatmul.mubr.msk.f32.gmra.mrb[76].mxu0 %vm1230_vm1, %v1196_v16 }
 0x215   :  { %v1197_v24 = vmax.f32 %v1063_v22, 0.0  ;;  %v2884_v12 = vpop.f32.mrb[80].mxu1 }
 0x216   :  { %v1078_v25 = vadd.f32 %v2884_v12, %v3749_v58  ;;  %v1072_v10 = vpop.f32.mrb[81].mxu1 }
 0x217   :  { %v1073_v28 = vadd.f32 %v3749_v58, %v1072_v10  ;;  %2991 = vmatprep.mubr.msk.f32.mxu0 %vm1230_vm1, %v1197_v24 }
 0x218   :  { %v1200_v20 = vmax.f32 %v1078_v25, 0.0  ;;  %2992 = vmatmul.mubr.msk.f32.gmra.mrb[78].mxu0 %vm1230_vm1, %v1198_v2 }
 0x219   :  { %v1199_v30 = vmax.f32 %v1073_v28, 0.0  ;;  %v2887_v18 = vpop.f32.mrb[82].mxu1 }
 0x21a   :  { %v1088_v31 = vadd.f32 %v2887_v18, %v3749_v58  ;;  %v1082_v29 = vpop.f32.mrb[83].mxu1 }
 0x21b   :  { %v1083_v33 = vadd.f32 %v3749_v58, %v1082_v29  ;;  %2994 = vmatprep.mubr.msk.f32.mxu0 %vm1230_vm1, %v1199_v30 }
 0x21c   :  { %v1202_v26 = vmax.f32 %v1088_v31, 0.0  ;;  %2995 = vmatmul.mubr.msk.f32.gmra.mrb[80].mxu0 %vm1230_vm1, %v1200_v20 }
 0x21d   :  { %v1201_v36 = vmax.f32 %v1083_v33, 0.0  ;;  %v2890_v37 = vpop.f32.mrb[84].mxu1 }
 0x21e   :  { %v1098_v38 = vadd.f32 %v2890_v37, %v3749_v58  ;;  %v1092_v35 = vpop.f32.mrb[85].mxu1 }
 0x21f   :  { %v1093_v39 = vadd.f32 %v3749_v58, %v1092_v35  ;;  %2997 = vmatprep.mubr.msk.f32.mxu0 %vm1230_vm1, %v1201_v36 }
 0x220   :  { %v1204_v46 = vmax.f32 %v1098_v38, 0.0  ;;  %2998 = vmatmul.mubr.msk.f32.gmra.mrb[82].mxu0 %vm1230_vm1, %v1202_v26 }
 0x221   :  { %v1203_v40 = vmax.f32 %v1093_v39, 0.0  ;;  %v2893_v44 = vpop.f32.mrb[86].mxu1 }
 0x222   :  { %v1108_v41 = vadd.f32 %v2893_v44, %v3749_v58  ;;  %v1102_v56 = vpop.f32.mrb[87].mxu1 }
 0x223   :  { %v1103_v45 = vadd.f32 %v3749_v58, %v1102_v56  ;;  %3000 = vmatprep.mubr.msk.f32.mxu0 %vm1230_vm1, %v1203_v40 }
 0x224   :  { %v1206_v53 = vmax.f32 %v1108_v41, 0.0  ;;  %3001 = vmatmul.mubr.msk.f32.gmra.mrb[84].mxu0 %vm1230_vm1, %v1204_v46 }
 0x225   :  { %v1205_v49 = vmax.f32 %v1103_v45, 0.0  ;;  %v2896_v1 = vpop.f32.mrb[88].mxu1 }
 0x226   :  { %v1118_v50 = vadd.f32 %v2896_v1, %v3749_v58  ;;  %v1112_v63 = vpop.f32.mrb[89].mxu1 }
 0x227   :  { %v1113_v51 = vadd.f32 %v3749_v58, %v1112_v63  ;;  %3003 = vmatprep.mubr.msk.f32.mxu0 %vm1230_vm1, %v1205_v49 }
 0x228   :  { %v1208_v13 = vmax.f32 %v1118_v50, 0.0  ;;  %3004 = vmatmul.mubr.msk.f32.gmra.mrb[86].mxu0 %vm1230_vm1, %v1206_v53 }
 0x229   :  { %v1207_v52 = vmax.f32 %v1113_v51, 0.0  ;;  %v2899_v9 = vpop.f32.mrb[90].mxu1 }
 0x22a   :  { %v1128_v54 = vadd.f32 %v2899_v9, %v3749_v58  ;;  %v1122_v23 = vpop.f32.mrb[91].mxu1 }
 0x22b   :  { %v1123_v57 = vadd.f32 %v3749_v58, %v1122_v23  ;;  %3006 = vmatprep.mubr.msk.f32.mxu0 %vm1230_vm1, %v1207_v52 }
 0x22c   :  { %v1210_v21 = vmax.f32 %v1128_v54, 0.0  ;;  %3007 = vmatmul.mubr.msk.f32.gmra.mrb[88].mxu0 %vm1230_vm1, %v1208_v13 }
 0x22d   :  { %v1209_v60 = vmax.f32 %v1123_v57, 0.0  ;;  %v2902_v34 = vpop.f32.mrb[92].mxu1 }
 0x22e   :  { %v1138_v61 = vadd.f32 %v2902_v34, %v3749_v58  ;;  %v1132_v32 = vpop.f32.mrb[93].mxu1 }
 0x22f   :  { %v1133_v0 = vadd.f32 %v3749_v58, %v1132_v32  ;;  %3009 = vmatprep.mubr.msk.f32.mxu0 %vm1230_vm1, %v1209_v60 }
 0x230   :  { %v1212_v48 = vmax.f32 %v1138_v61, 0.0  ;;  %3010 = vmatmul.mubr.msk.f32.gmra.mrb[90].mxu0 %vm1230_vm1, %v1210_v21 }
 0x231   :  { %v1211_v3 = vmax.f32 %v1133_v0, 0.0  ;;  %v2905_v42 = vpop.f32.mrb[94].mxu1 }
 0x232   :  { %v1148_v47 = vadd.f32 %v2905_v42, %v3749_v58  ;;  %v1142_v6 = vpop.f32.mrb[95].mxu1 }
 0x233   :  { %v1143_v62 = vadd.f32 %v3749_v58, %v1142_v6  ;;  %3012 = vmatprep.mubr.msk.f32.mxu0 %vm1230_vm1, %v1211_v3 }
 0x234   :  { %v1214_v7 = vmax.f32 %v1148_v47, 0.0  ;;  %3013 = vmatmul.mubr.msk.f32.gmra.mrb[92].mxu0 %vm1230_vm1, %v1212_v48 }
 0x235   :  { %v1213_v8 = vmax.f32 %v1143_v62, 0.0 }
 0x237   :  { %3015 = vmatprep.mubr.msk.f32.mxu0 %vm1230_vm1, %v1213_v8 }
 0x238   :  { %3016 = vmatmul.mubr.msk.f32.gmra.mrb[94].mxu0 %vm1230_vm1, %v1214_v7 }
 0x28f   :  { %v2924_v43 = vpop.f32.mrb[32].mxu0 }
 0x290   :  { %v1495_v27 = vadd.f32 %v2924_v43, %v3882_v11  ;;  %v1489_v58 = vpop.f32.mrb[33].mxu0 }
 0x291   :  { %v1490_v5 = vadd.f32 %v3882_v11, %v1489_v58 }
 0x292   :  { %1810 = vst.msk [vmem:[%s4531_s7 + $0x8] sm:$0xff] %vm1808_vm2, %v1495_v27  ;;  %v1875_v14 = vmul.f32 1.442695, %v1495_v27 }
 0x293   :  { %1809 = vst.msk [vmem:[%s4531_s7] sm:$0xff] %vm1808_vm2, %v1490_v5  ;;  %v1873_v59 = vmul.f32 1.442695, %v1490_v5  ;;  %v2927_v15 = vpop.f32.mrb[34].mxu0 }
 0x294   :  { %3073 = vpow2.f32 %v1875_v14  ;;  %v1505_v16 = vadd.f32 %v2927_v15, %v3882_v11  ;;  %v1499_v17 = vpop.f32.mrb[35].mxu0 }
 0x295   :  { %v1500_v55 = vadd.f32 %v3882_v11, %v1499_v17  ;;  %3075 = vpow2.f32 %v1873_v59 }
 0x296   :  { %1812 = vst.msk [vmem:[%s4531_s7 + $0x18] sm:$0xff] %vm1808_vm2, %v1505_v16  ;;  %v1879_v19 = vmul.f32 1.442695, %v1505_v16 }
 0x297   :  { %1811 = vst.msk [vmem:[%s4531_s7 + $0x10] sm:$0xff] %vm1808_vm2, %v1500_v55  ;;  %v2930_v4 = vpop.f32.mrb[36].mxu0  ;;  %v1877_v22 = vmul.f32 1.442695, %v1500_v55 }
 0x298   :  { %3077 = vpow2.f32 %v1879_v19  ;;  %v1515_v2 = vadd.f32 %v2930_v4, %v3882_v11  ;;  %v1509_v24 = vpop.f32.mrb[37].mxu0 }
 0x299   :  { %v1510_v12 = vadd.f32 %v3882_v11, %v1509_v24  ;;  %3079 = vpow2.f32 %v1877_v22 }
 0x29a   :  { %1814 = vst.msk [vmem:[%s4531_s7 + $0x28] sm:$0xff] %vm1808_vm2, %v1515_v2  ;;  %v1883_v28 = vmul.f32 1.442695, %v1515_v2 }
 0x29b   :  { %1813 = vst.msk [vmem:[%s4531_s7 + $0x20] sm:$0xff] %vm1808_vm2, %v1510_v12  ;;  %v1881_v25 = vmul.f32 1.442695, %v1510_v12  ;;  %v2933_v10 = vpop.f32.mrb[38].mxu0 }
 0x29c   :  { %v1525_v20 = vadd.f32 %v2933_v10, %v3882_v11  ;;  %v1519_v30 = vpop.f32.mrb[39].mxu0 }
 0x29d   :  { %3081 = vpow2.f32 %v1881_v25  ;;  %v1520_v18 = vadd.f32 %v3882_v11, %v1519_v30 }
 0x29e   :  { %v3074_v31 = vpop.eup %3073  ;;  %1816 = vst.msk [vmem:[%s4531_s7 + $0x38] sm:$0xff] %vm1808_vm2, %v1525_v20  ;;  %3083 = vpow2.f32 %v1883_v28  ;;  %v1887_v26 = vmul.f32 1.442695, %v1525_v20 }
 0x29f   :  { %1815 = vst.msk [vmem:[%s4531_s7 + $0x30] sm:$0xff] %vm1808_vm2, %v1520_v18  ;;  %v1885_v29 = vmul.f32 1.442695, %v1520_v18  ;;  %2067 = vrot.lane.b32.xlu0 %v3074_v31, %s3201_s13  ;;  %v2936_v33 = vpop.f32.mrb[40].mxu0  ;;  %v3076_v38 = vpop.eup %3075 }
 0x2a0   :  { %v1535_v36 = vadd.f32 %v2936_v33, %v3882_v11  ;;  %v1529_v37 = vpop.f32.mrb[41].mxu0 }
 0x2a1   :  { %3085 = vpow2.f32 %v1885_v29  ;;  %v1530_v35 = vadd.f32 %v3882_v11, %v1529_v37 }
 0x2a2   :  { %v3078_v39 = vpop.eup %3077  ;;  %1818 = vst.msk [vmem:[%s4531_s7 + $0x48] sm:$0xff] %vm1808_vm2, %v1535_v36  ;;  %3087 = vpow2.f32 %v1887_v26  ;;  %v1891_v44 = vmul.f32 1.442695, %v1535_v36 }
 0x2a3   :  { %1817 = vst.msk [vmem:[%s4531_s7 + $0x40] sm:$0xff] %vm1808_vm2, %v1530_v35  ;;  %v1889_v46 = vmul.f32 1.442695, %v1530_v35  ;;  %2071 = vrot.lane.b32.xlu1 %v3078_v39, %s3201_s13  ;;  %v2939_v40 = vpop.f32.mrb[42].mxu0  ;;  %2065 = vrot.lane.b32.xlu0 %v3076_v38, %s3201_s13  ;;  %v3080_v53 = vpop.eup %3079 }
 0x2a4   :  { %v1545_v41 = vadd.f32 %v2939_v40, %v3882_v11  ;;  %v1539_v56 = vpop.f32.mrb[43].mxu0 }
 0x2a5   :  { %3089 = vpow2.f32 %v1889_v46  ;;  %v1540_v45 = vadd.f32 %v3882_v11, %v1539_v56 }
 0x2a6   :  { %1820 = vst.msk [vmem:[%s4531_s7 + $0x58] sm:$0xff] %vm1808_vm2, %v1545_v41  ;;  %3091 = vpow2.f32 %v1891_v44  ;;  %v1895_v63 = vmul.f32 1.442695, %v1545_v41 }
 0x2a7   :  { %v3082_v49 = vpop.eup %3081  ;;  %1819 = vst.msk [vmem:[%s4531_s7 + $0x50] sm:$0xff] %vm1808_vm2, %v1540_v45  ;;  %v1893_v1 = vmul.f32 1.442695, %v1540_v45  ;;  %v2942_v50 = vpop.f32.mrb[44].mxu0  ;;  %2069 = vrot.lane.b32.xlu1 %v3080_v53, %s3201_s13 }
 0x2a8   :  { %v1555_v51 = vadd.f32 %v2942_v50, %v3882_v11  ;;  %v1549_v13 = vpop.f32.mrb[45].mxu0  ;;  %2073 = vrot.lane.b32.xlu0 %v3082_v49, %s3201_s13  ;;  %v3084_v9 = vpop.eup %3083 }
 0x2a9   :  { %3093 = vpow2.f32 %v1893_v1  ;;  %v1550_v52 = vadd.f32 %v3882_v11, %v1549_v13 }
 0x2aa   :  { %1822 = vst.msk [vmem:[%s4531_s7 + $0x68] sm:$0xff] %vm1808_vm2, %v1555_v51  ;;  %3095 = vpow2.f32 %v1895_v63  ;;  %v1899_v21 = vmul.f32 1.442695, %v1555_v51 }
 0x2ab   :  { %v3086_v54 = vpop.eup %3085  ;;  %1821 = vst.msk [vmem:[%s4531_s7 + $0x60] sm:$0xff] %vm1808_vm2, %v1550_v52  ;;  %v1897_v23 = vmul.f32 1.442695, %v1550_v52  ;;  %v2945_v57 = vpop.f32.mrb[46].mxu0  ;;  %2075 = vrot.lane.b32.xlu1 %v3084_v9, %s3201_s13 }
 0x2ac   :  { %v1565_v60 = vadd.f32 %v2945_v57, %v3882_v11  ;;  %v1559_v34 = vpop.f32.mrb[47].mxu0  ;;  %2077 = vrot.lane.b32.xlu0 %v3086_v54, %s3201_s13  ;;  %v3088_v32 = vpop.eup %3087 }
 0x2ad   :  { %3097 = vpow2.f32 %v1897_v23  ;;  %v1560_v61 = vadd.f32 %v3882_v11, %v1559_v34 }
 0x2ae   :  { %1824 = vst.msk [vmem:[%s4531_s7 + $0x78] sm:$0xff] %vm1808_vm2, %v1565_v60  ;;  %3099 = vpow2.f32 %v1899_v21  ;;  %v1903_v42 = vmul.f32 1.442695, %v1565_v60 }
 0x2af   :  { %v3090_v0 = vpop.eup %3089  ;;  %1823 = vst.msk [vmem:[%s4531_s7 + $0x70] sm:$0xff] %vm1808_vm2, %v1560_v61  ;;  %v1901_v48 = vmul.f32 1.442695, %v1560_v61  ;;  %v2948_v3 = vpop.f32.mrb[48].mxu0  ;;  %2079 = vrot.lane.b32.xlu1 %v3088_v32, %s3201_s13 }
 0x2b0   :  { %v1575_v47 = vadd.f32 %v2948_v3, %v3882_v11  ;;  %v1569_v6 = vpop.f32.mrb[49].mxu0  ;;  %2081 = vrot.lane.b32.xlu0 %v3090_v0, %s3201_s13  ;;  %v3092_v7 = vpop.eup %3091 }
 0x2b1   :  { %3101 = vpow2.f32 %v1901_v48  ;;  %v1570_v62 = vadd.f32 %v3882_v11, %v1569_v6 }
 0x2b2   :  { %1826 = vst.msk [vmem:[%s4531_s7 + $0x88] sm:$0xff] %vm1808_vm2, %v1575_v47  ;;  %3103 = vpow2.f32 %v1903_v42  ;;  %v1907_v58 = vmul.f32 1.442695, %v1575_v47 }
 0x2b3   :  { %v3094_v8 = vpop.eup %3093  ;;  %1825 = vst.msk [vmem:[%s4531_s7 + $0x80] sm:$0xff] %vm1808_vm2, %v1570_v62  ;;  %v1905_v43 = vmul.f32 1.442695, %v1570_v62  ;;  %v2951_v27 = vpop.f32.mrb[50].mxu0  ;;  %2083 = vrot.lane.b32.xlu1 %v3092_v7, %s3201_s13 }
 0x2b4   :  { %v1585_v5 = vadd.f32 %v2951_v27, %v3882_v11  ;;  %v1579_v14 = vpop.f32.mrb[51].mxu0  ;;  %2085 = vrot.lane.b32.xlu0 %v3094_v8, %s3201_s13  ;;  %v3096_v15 = vpop.eup %3095 }
 0x2b5   :  { %3105 = vpow2.f32 %v1905_v43  ;;  %v1580_v59 = vadd.f32 %v3882_v11, %v1579_v14 }
 0x2b6   :  { %1828 = vst.msk [vmem:[%s4531_s7 + $0x98] sm:$0xff] %vm1808_vm2, %v1585_v5  ;;  %3107 = vpow2.f32 %v1907_v58  ;;  %v1911_v19 = vmul.f32 1.442695, %v1585_v5 }
 0x2b7   :  { %v3098_v16 = vpop.eup %3097  ;;  %1827 = vst.msk [vmem:[%s4531_s7 + $0x90] sm:$0xff] %vm1808_vm2, %v1580_v59  ;;  %v1909_v17 = vmul.f32 1.442695, %v1580_v59  ;;  %v2954_v55 = vpop.f32.mrb[52].mxu0  ;;  %2087 = vrot.lane.b32.xlu1 %v3096_v15, %s3201_s13 }
 0x2b8   :  { %v1595_v4 = vadd.f32 %v2954_v55, %v3882_v11  ;;  %v1589_v22 = vpop.f32.mrb[53].mxu0  ;;  %2089 = vrot.lane.b32.xlu0 %v3098_v16, %s3201_s13  ;;  %v3100_v24 = vpop.eup %3099 }
 0x2b9   :  { %3109 = vpow2.f32 %v1909_v17  ;;  %v1590_v2 = vadd.f32 %v3882_v11, %v1589_v22 }
 0x2ba   :  { %1830 = vst.msk [vmem:[%s4531_s7 + $0xa8] sm:$0xff] %vm1808_vm2, %v1595_v4  ;;  %3111 = vpow2.f32 %v1911_v19  ;;  %v1915_v28 = vmul.f32 1.442695, %v1595_v4 }
 0x2bb   :  { %v3102_v12 = vpop.eup %3101  ;;  %1829 = vst.msk [vmem:[%s4531_s7 + $0xa0] sm:$0xff] %vm1808_vm2, %v1590_v2  ;;  %v1913_v25 = vmul.f32 1.442695, %v1590_v2  ;;  %v2957_v10 = vpop.f32.mrb[54].mxu0  ;;  %2091 = vrot.lane.b32.xlu1 %v3100_v24, %s3201_s13 }
 0x2bc   :  { %v1605_v20 = vadd.f32 %v2957_v10, %v3882_v11  ;;  %v1599_v30 = vpop.f32.mrb[55].mxu0  ;;  %2093 = vrot.lane.b32.xlu0 %v3102_v12, %s3201_s13  ;;  %v3104_v31 = vpop.eup %3103 }
 0x2bd   :  { %3113 = vpow2.f32 %v1913_v25  ;;  %v1600_v18 = vadd.f32 %v3882_v11, %v1599_v30 }
 0x2be   :  { %1832 = vst.msk [vmem:[%s4531_s7 + $0xb8] sm:$0xff] %vm1808_vm2, %v1605_v20  ;;  %3115 = vpow2.f32 %v1915_v28  ;;  %v1919_v36 = vmul.f32 1.442695, %v1605_v20 }
 0x2bf   :  { %v3106_v29 = vpop.eup %3105  ;;  %1831 = vst.msk [vmem:[%s4531_s7 + $0xb0] sm:$0xff] %vm1808_vm2, %v1600_v18  ;;  %v1917_v33 = vmul.f32 1.442695, %v1600_v18  ;;  %v2960_v26 = vpop.f32.mrb[56].mxu0  ;;  %2095 = vrot.lane.b32.xlu1 %v3104_v31, %s3201_s13 }
 0x2c0   :  { %v1615_v37 = vadd.f32 %v2960_v26, %v3882_v11  ;;  %v1609_v38 = vpop.f32.mrb[57].mxu0  ;;  %2097 = vrot.lane.b32.xlu0 %v3106_v29, %s3201_s13  ;;  %v3108_v39 = vpop.eup %3107 }
 0x2c1   :  { %3117 = vpow2.f32 %v1917_v33  ;;  %v1610_v35 = vadd.f32 %v3882_v11, %v1609_v38 }
 0x2c2   :  { %1834 = vst.msk [vmem:[%s4531_s7 + $0xc8] sm:$0xff] %vm1808_vm2, %v1615_v37  ;;  %3119 = vpow2.f32 %v1919_v36  ;;  %v1923_v41 = vmul.f32 1.442695, %v1615_v37 }
 0x2c3   :  { %v3110_v46 = vpop.eup %3109  ;;  %1833 = vst.msk [vmem:[%s4531_s7 + $0xc0] sm:$0xff] %vm1808_vm2, %v1610_v35  ;;  %v1921_v40 = vmul.f32 1.442695, %v1610_v35  ;;  %v2963_v44 = vpop.f32.mrb[58].mxu0  ;;  %2099 = vrot.lane.b32.xlu1 %v3108_v39, %s3201_s13 }
 0x2c4   :  { %v1625_v56 = vadd.f32 %v2963_v44, %v3882_v11  ;;  %v1619_v45 = vpop.f32.mrb[59].mxu0  ;;  %2101 = vrot.lane.b32.xlu0 %v3110_v46, %s3201_s13  ;;  %v3112_v49 = vpop.eup %3111 }
 0x2c5   :  { %3121 = vpow2.f32 %v1921_v40  ;;  %v1620_v53 = vadd.f32 %v3882_v11, %v1619_v45 }
 0x2c6   :  { %1836 = vst.msk [vmem:[%s4531_s7 + $0xd8] sm:$0xff] %vm1808_vm2, %v1625_v56  ;;  %3123 = vpow2.f32 %v1923_v41  ;;  %v1927_v51 = vmul.f32 1.442695, %v1625_v56 }
 0x2c7   :  { %v3114_v1 = vpop.eup %3113  ;;  %1835 = vst.msk [vmem:[%s4531_s7 + $0xd0] sm:$0xff] %vm1808_vm2, %v1620_v53  ;;  %v1925_v50 = vmul.f32 1.442695, %v1620_v53  ;;  %v2966_v63 = vpop.f32.mrb[60].mxu0  ;;  %2103 = vrot.lane.b32.xlu1 %v3112_v49, %s3201_s13 }
 0x2c8   :  { %v1635_v13 = vadd.f32 %v2966_v63, %v3882_v11  ;;  %v1629_v52 = vpop.f32.mrb[61].mxu0  ;;  %2105 = vrot.lane.b32.xlu0 %v3114_v1, %s3201_s13  ;;  %v3116_v54 = vpop.eup %3115 }
 0x2c9   :  { %3125 = vpow2.f32 %v1925_v50  ;;  %v1630_v9 = vadd.f32 %v3882_v11, %v1629_v52 }
 0x2ca   :  { %1838 = vst.msk [vmem:[%s4531_s7 + $0xe8] sm:$0xff] %vm1808_vm2, %v1635_v13  ;;  %3127 = vpow2.f32 %v1927_v51  ;;  %v1931_v60 = vmul.f32 1.442695, %v1635_v13 }
 0x2cb   :  { %v3118_v23 = vpop.eup %3117  ;;  %1837 = vst.msk [vmem:[%s4531_s7 + $0xe0] sm:$0xff] %vm1808_vm2, %v1630_v9  ;;  %v1929_v57 = vmul.f32 1.442695, %v1630_v9  ;;  %v2969_v21 = vpop.f32.mrb[62].mxu0  ;;  %2107 = vrot.lane.b32.xlu1 %v3116_v54, %s3201_s13 }
 0x2cc   :  { %v1645_v34 = vadd.f32 %v2969_v21, %v3882_v11  ;;  %v1639_v61 = vpop.f32.mrb[63].mxu0  ;;  %2109 = vrot.lane.b32.xlu0 %v3118_v23, %s3201_s13  ;;  %v3120_v0 = vpop.eup %3119 }
 0x2cd   :  { %3129 = vpow2.f32 %v1929_v57  ;;  %v1640_v32 = vadd.f32 %v3882_v11, %v1639_v61 }
 0x2ce   :  { %1840 = vst.msk [vmem:[%s4531_s7 + $0xf8] sm:$0xff] %vm1808_vm2, %v1645_v34  ;;  %3131 = vpow2.f32 %v1931_v60  ;;  %v1935_v47 = vmul.f32 1.442695, %v1645_v34 }
 0x2cf   :  { %v3122_v48 = vpop.eup %3121  ;;  %1839 = vst.msk [vmem:[%s4531_s7 + $0xf0] sm:$0xff] %vm1808_vm2, %v1640_v32  ;;  %v1933_v3 = vmul.f32 1.442695, %v1640_v32  ;;  %v2972_v42 = vpop.f32.mrb[64].mxu0  ;;  %2111 = vrot.lane.b32.xlu1 %v3120_v0, %s3201_s13 }
 0x2d0   :  { %v1655_v6 = vadd.f32 %v2972_v42, %v3882_v11  ;;  %v1649_v62 = vpop.f32.mrb[65].mxu0  ;;  %2113 = vrot.lane.b32.xlu0 %v3122_v48, %s3201_s13  ;;  %v3124_v8 = vpop.eup %3123 }
 0x2d1   :  { %3133 = vpow2.f32 %v1933_v3  ;;  %v1650_v7 = vadd.f32 %v3882_v11, %v1649_v62 }
 0x2d2   :  { %1842 = vst.msk [vmem:[%s4531_s7 + $0x108] sm:$0xff] %vm1808_vm2, %v1655_v6  ;;  %3135 = vpow2.f32 %v1935_v47  ;;  %v1939_v5 = vmul.f32 1.442695, %v1655_v6 }
 0x2d3   :  { %v3126_v43 = vpop.eup %3125  ;;  %1841 = vst.msk [vmem:[%s4531_s7 + $0x100] sm:$0xff] %vm1808_vm2, %v1650_v7  ;;  %v1937_v27 = vmul.f32 1.442695, %v1650_v7  ;;  %v2975_v58 = vpop.f32.mrb[66].mxu0  ;;  %2115 = vrot.lane.b32.xlu1 %v3124_v8, %s3201_s13 }
 0x2d4   :  { %v1665_v14 = vadd.f32 %v2975_v58, %v3882_v11  ;;  %v1659_v59 = vpop.f32.mrb[67].mxu0  ;;  %2117 = vrot.lane.b32.xlu0 %v3126_v43, %s3201_s13  ;;  %v3128_v16 = vpop.eup %3127 }
 0x2d5   :  { %3137 = vpow2.f32 %v1937_v27  ;;  %v1660_v15 = vadd.f32 %v3882_v11, %v1659_v59 }
 0x2d6   :  { %1844 = vst.msk [vmem:[%s4531_s7 + $0x118] sm:$0xff] %vm1808_vm2, %v1665_v14  ;;  %3139 = vpow2.f32 %v1939_v5  ;;  %v1943_v4 = vmul.f32 1.442695, %v1665_v14 }
 0x2d7   :  { %v3130_v17 = vpop.eup %3129  ;;  %1843 = vst.msk [vmem:[%s4531_s7 + $0x110] sm:$0xff] %vm1808_vm2, %v1660_v15  ;;  %v1941_v55 = vmul.f32 1.442695, %v1660_v15  ;;  %v2978_v19 = vpop.f32.mrb[68].mxu0  ;;  %2119 = vrot.lane.b32.xlu1 %v3128_v16, %s3201_s13 }
 0x2d8   :  { %v1675_v22 = vadd.f32 %v2978_v19, %v3882_v11  ;;  %v1669_v2 = vpop.f32.mrb[69].mxu0  ;;  %2121 = vrot.lane.b32.xlu0 %v3130_v17, %s3201_s13  ;;  %v3132_v12 = vpop.eup %3131 }
 0x2d9   :  { %3141 = vpow2.f32 %v1941_v55  ;;  %v1670_v24 = vadd.f32 %v3882_v11, %v1669_v2 }
 0x2da   :  { %1846 = vst.msk [vmem:[%s4531_s7 + $0x128] sm:$0xff] %vm1808_vm2, %v1675_v22  ;;  %3143 = vpow2.f32 %v1943_v4  ;;  %v1947_v20 = vmul.f32 1.442695, %v1675_v22 }
 0x2db   :  { %v3134_v25 = vpop.eup %3133  ;;  %1845 = vst.msk [vmem:[%s4531_s7 + $0x120] sm:$0xff] %vm1808_vm2, %v1670_v24  ;;  %v1945_v10 = vmul.f32 1.442695, %v1670_v24  ;;  %v2981_v28 = vpop.f32.mrb[70].mxu0  ;;  %2123 = vrot.lane.b32.xlu1 %v3132_v12, %s3201_s13 }
 0x2dc   :  { %v1685_v30 = vadd.f32 %v2981_v28, %v3882_v11  ;;  %v1679_v18 = vpop.f32.mrb[71].mxu0  ;;  %2125 = vrot.lane.b32.xlu0 %v3134_v25, %s3201_s13  ;;  %v3136_v29 = vpop.eup %3135 }
 0x2dd   :  { %3145 = vpow2.f32 %v1945_v10  ;;  %v1680_v31 = vadd.f32 %v3882_v11, %v1679_v18 }
 0x2de   :  { %1848 = vst.msk [vmem:[%s4531_s7 + $0x138] sm:$0xff] %vm1808_vm2, %v1685_v30  ;;  %3147 = vpow2.f32 %v1947_v20  ;;  %v1951_v37 = vmul.f32 1.442695, %v1685_v30 }
 0x2df   :  { %v3138_v33 = vpop.eup %3137  ;;  %1847 = vst.msk [vmem:[%s4531_s7 + $0x130] sm:$0xff] %vm1808_vm2, %v1680_v31  ;;  %v1949_v26 = vmul.f32 1.442695, %v1680_v31  ;;  %v2984_v36 = vpop.f32.mrb[72].mxu0  ;;  %2127 = vrot.lane.b32.xlu1 %v3136_v29, %s3201_s13 }
 0x2e0   :  { %v1695_v38 = vadd.f32 %v2984_v36, %v3882_v11  ;;  %v1689_v35 = vpop.f32.mrb[73].mxu0  ;;  %2129 = vrot.lane.b32.xlu0 %v3138_v33, %s3201_s13  ;;  %v3140_v46 = vpop.eup %3139 }
 0x2e1   :  { %3149 = vpow2.f32 %v1949_v26  ;;  %v1690_v39 = vadd.f32 %v3882_v11, %v1689_v35 }
 0x2e2   :  { %1850 = vst.msk [vmem:[%s4531_s7 + $0x148] sm:$0xff] %vm1808_vm2, %v1695_v38  ;;  %3151 = vpow2.f32 %v1951_v37  ;;  %v1955_v56 = vmul.f32 1.442695, %v1695_v38 }
 0x2e3   :  { %v3142_v40 = vpop.eup %3141  ;;  %1849 = vst.msk [vmem:[%s4531_s7 + $0x140] sm:$0xff] %vm1808_vm2, %v1690_v39  ;;  %v1953_v44 = vmul.f32 1.442695, %v1690_v39  ;;  %v2987_v41 = vpop.f32.mrb[74].mxu0  ;;  %2131 = vrot.lane.b32.xlu1 %v3140_v46, %s3201_s13 }
 0x2e4   :  { %v1705_v45 = vadd.f32 %v2987_v41, %v3882_v11  ;;  %v1699_v53 = vpop.f32.mrb[75].mxu0  ;;  %2133 = vrot.lane.b32.xlu0 %v3142_v40, %s3201_s13  ;;  %v3144_v1 = vpop.eup %3143 }
 0x2e5   :  { %3153 = vpow2.f32 %v1953_v44  ;;  %v1700_v49 = vadd.f32 %v3882_v11, %v1699_v53 }
 0x2e6   :  { %1852 = vst.msk [vmem:[%s4531_s7 + $0x158] sm:$0xff] %vm1808_vm2, %v1705_v45  ;;  %3155 = vpow2.f32 %v1955_v56  ;;  %v1959_v13 = vmul.f32 1.442695, %v1705_v45 }
 0x2e7   :  { %v3146_v50 = vpop.eup %3145  ;;  %1851 = vst.msk [vmem:[%s4531_s7 + $0x150] sm:$0xff] %vm1808_vm2, %v1700_v49  ;;  %v1957_v63 = vmul.f32 1.442695, %v1700_v49  ;;  %v2990_v51 = vpop.f32.mrb[76].mxu0  ;;  %2135 = vrot.lane.b32.xlu1 %v3144_v1, %s3201_s13 }
 0x2e8   :  { %v1715_v52 = vadd.f32 %v2990_v51, %v3882_v11  ;;  %v1709_v9 = vpop.f32.mrb[77].mxu0  ;;  %2137 = vrot.lane.b32.xlu0 %v3146_v50, %s3201_s13  ;;  %v3148_v23 = vpop.eup %3147 }
 0x2e9   :  { %3157 = vpow2.f32 %v1957_v63  ;;  %v1710_v54 = vadd.f32 %v3882_v11, %v1709_v9 }
 0x2ea   :  { %1854 = vst.msk [vmem:[%s4531_s7 + $0x168] sm:$0xff] %vm1808_vm2, %v1715_v52  ;;  %3159 = vpow2.f32 %v1959_v13  ;;  %v1963_v34 = vmul.f32 1.442695, %v1715_v52 }
 0x2eb   :  { %v3150_v57 = vpop.eup %3149  ;;  %1853 = vst.msk [vmem:[%s4531_s7 + $0x160] sm:$0xff] %vm1808_vm2, %v1710_v54  ;;  %v1961_v21 = vmul.f32 1.442695, %v1710_v54  ;;  %v2993_v60 = vpop.f32.mrb[78].mxu0  ;;  %2139 = vrot.lane.b32.xlu1 %v3148_v23, %s3201_s13 }
 0x2ec   :  { %v1725_v61 = vadd.f32 %v2993_v60, %v3882_v11  ;;  %v1719_v32 = vpop.f32.mrb[79].mxu0  ;;  %2141 = vrot.lane.b32.xlu0 %v3150_v57, %s3201_s13  ;;  %v3152_v48 = vpop.eup %3151 }
 0x2ed   :  { %3161 = vpow2.f32 %v1961_v21  ;;  %v1720_v0 = vadd.f32 %v3882_v11, %v1719_v32 }
 0x2ee   :  { %1856 = vst.msk [vmem:[%s4531_s7 + $0x178] sm:$0xff] %vm1808_vm2, %v1725_v61  ;;  %3163 = vpow2.f32 %v1963_v34  ;;  %v1967_v6 = vmul.f32 1.442695, %v1725_v61 }
 0x2ef   :  { %v3154_v3 = vpop.eup %3153  ;;  %1855 = vst.msk [vmem:[%s4531_s7 + $0x170] sm:$0xff] %vm1808_vm2, %v1720_v0  ;;  %v1965_v42 = vmul.f32 1.442695, %v1720_v0  ;;  %v2996_v47 = vpop.f32.mrb[80].mxu0  ;;  %2143 = vrot.lane.b32.xlu1 %v3152_v48, %s3201_s13 }
 0x2f0   :  { %v1735_v62 = vadd.f32 %v2996_v47, %v3882_v11  ;;  %v1729_v7 = vpop.f32.mrb[81].mxu0  ;;  %2145 = vrot.lane.b32.xlu0 %v3154_v3, %s3201_s13  ;;  %v3156_v43 = vpop.eup %3155 }
 0x2f1   :  { %3165 = vpow2.f32 %v1965_v42  ;;  %v1730_v8 = vadd.f32 %v3882_v11, %v1729_v7 }
 0x2f2   :  { %1858 = vst.msk [vmem:[%s4531_s7 + $0x188] sm:$0xff] %vm1808_vm2, %v1735_v62  ;;  %3167 = vpow2.f32 %v1967_v6  ;;  %v1971_v14 = vmul.f32 1.442695, %v1735_v62 }
 0x2f3   :  { %v3158_v27 = vpop.eup %3157  ;;  %1857 = vst.msk [vmem:[%s4531_s7 + $0x180] sm:$0xff] %vm1808_vm2, %v1730_v8  ;;  %v1969_v58 = vmul.f32 1.442695, %v1730_v8  ;;  %v2999_v5 = vpop.f32.mrb[82].mxu0  ;;  %2147 = vrot.lane.b32.xlu1 %v3156_v43, %s3201_s13 }
 0x2f4   :  { %v1745_v59 = vadd.f32 %v2999_v5, %v3882_v11  ;;  %v1739_v15 = vpop.f32.mrb[83].mxu0  ;;  %2149 = vrot.lane.b32.xlu0 %v3158_v27, %s3201_s13  ;;  %v3160_v17 = vpop.eup %3159 }
 0x2f5   :  { %3169 = vpow2.f32 %v1969_v58  ;;  %v1740_v16 = vadd.f32 %v3882_v11, %v1739_v15 }
 0x2f6   :  { %1860 = vst.msk [vmem:[%s4531_s7 + $0x198] sm:$0xff] %vm1808_vm2, %v1745_v59  ;;  %3171 = vpow2.f32 %v1971_v14  ;;  %v1975_v22 = vmul.f32 1.442695, %v1745_v59 }
 0x2f7   :  { %v3162_v55 = vpop.eup %3161  ;;  %1859 = vst.msk [vmem:[%s4531_s7 + $0x190] sm:$0xff] %vm1808_vm2, %v1740_v16  ;;  %v1973_v19 = vmul.f32 1.442695, %v1740_v16  ;;  %v3002_v4 = vpop.f32.mrb[84].mxu0  ;;  %2151 = vrot.lane.b32.xlu1 %v3160_v17, %s3201_s13 }
 0x2f8   :  { %v1755_v2 = vadd.f32 %v3002_v4, %v3882_v11  ;;  %v1749_v24 = vpop.f32.mrb[85].mxu0  ;;  %2153 = vrot.lane.b32.xlu0 %v3162_v55, %s3201_s13  ;;  %v3164_v25 = vpop.eup %3163 }
 0x2f9   :  { %3173 = vpow2.f32 %v1973_v19  ;;  %v1750_v12 = vadd.f32 %v3882_v11, %v1749_v24 }
 0x2fa   :  { %1862 = vst.msk [vmem:[%s4531_s7 + $0x1a8] sm:$0xff] %vm1808_vm2, %v1755_v2  ;;  %3175 = vpow2.f32 %v1975_v22  ;;  %v1979_v30 = vmul.f32 1.442695, %v1755_v2 }
 0x2fb   :  { %v3166_v10 = vpop.eup %3165  ;;  %1861 = vst.msk [vmem:[%s4531_s7 + $0x1a0] sm:$0xff] %vm1808_vm2, %v1750_v12  ;;  %v1977_v28 = vmul.f32 1.442695, %v1750_v12  ;;  %v3005_v20 = vpop.f32.mrb[86].mxu0  ;;  %2155 = vrot.lane.b32.xlu1 %v3164_v25, %s3201_s13 }
 0x2fc   :  { %v1765_v18 = vadd.f32 %v3005_v20, %v3882_v11  ;;  %v1759_v31 = vpop.f32.mrb[87].mxu0  ;;  %2157 = vrot.lane.b32.xlu0 %v3166_v10, %s3201_s13  ;;  %v3168_v33 = vpop.eup %3167 }
 0x2fd   :  { %3177 = vpow2.f32 %v1977_v28  ;;  %v1760_v29 = vadd.f32 %v3882_v11, %v1759_v31 }
 0x2fe   :  { %1864 = vst.msk [vmem:[%s4531_s7 + $0x1b8] sm:$0xff] %vm1808_vm2, %v1765_v18  ;;  %3179 = vpow2.f32 %v1979_v30  ;;  %v1983_v38 = vmul.f32 1.442695, %v1765_v18 }
 0x2ff   :  { %v3170_v26 = vpop.eup %3169  ;;  %1863 = vst.msk [vmem:[%s4531_s7 + $0x1b0] sm:$0xff] %vm1808_vm2, %v1760_v29  ;;  %v1981_v36 = vmul.f32 1.442695, %v1760_v29  ;;  %v3008_v37 = vpop.f32.mrb[88].mxu0  ;;  %2159 = vrot.lane.b32.xlu1 %v3168_v33, %s3201_s13 }
 0x300   :  { %v1775_v35 = vadd.f32 %v3008_v37, %v3882_v11  ;;  %v1769_v39 = vpop.f32.mrb[89].mxu0  ;;  %2161 = vrot.lane.b32.xlu0 %v3170_v26, %s3201_s13  ;;  %v3172_v40 = vpop.eup %3171 }
 0x301   :  { %3181 = vpow2.f32 %v1981_v36  ;;  %v1770_v46 = vadd.f32 %v3882_v11, %v1769_v39 }
 0x302   :  { %1866 = vst.msk [vmem:[%s4531_s7 + $0x1c8] sm:$0xff] %vm1808_vm2, %v1775_v35  ;;  %3183 = vpow2.f32 %v1983_v38  ;;  %v1987_v45 = vmul.f32 1.442695, %v1775_v35 }
 0x303   :  { %v3174_v44 = vpop.eup %3173  ;;  %1865 = vst.msk [vmem:[%s4531_s7 + $0x1c0] sm:$0xff] %vm1808_vm2, %v1770_v46  ;;  %v1985_v41 = vmul.f32 1.442695, %v1770_v46  ;;  %v3011_v56 = vpop.f32.mrb[90].mxu0  ;;  %2163 = vrot.lane.b32.xlu1 %v3172_v40, %s3201_s13 }
 0x304   :  { %v1785_v53 = vadd.f32 %v3011_v56, %v3882_v11  ;;  %v1779_v49 = vpop.f32.mrb[91].mxu0  ;;  %2165 = vrot.lane.b32.xlu0 %v3174_v44, %s3201_s13  ;;  %v3176_v50 = vpop.eup %3175 }
 0x305   :  { %3185 = vpow2.f32 %v1985_v41  ;;  %v1780_v1 = vadd.f32 %v3882_v11, %v1779_v49 }
 0x306   :  { %1868 = vst.msk [vmem:[%s4531_s7 + $0x1d8] sm:$0xff] %vm1808_vm2, %v1785_v53  ;;  %3187 = vpow2.f32 %v1987_v45  ;;  %v1991_v52 = vmul.f32 1.442695, %v1785_v53 }
 0x307   :  { %v3178_v63 = vpop.eup %3177  ;;  %1867 = vst.msk [vmem:[%s4531_s7 + $0x1d0] sm:$0xff] %vm1808_vm2, %v1780_v1  ;;  %v1989_v51 = vmul.f32 1.442695, %v1780_v1  ;;  %v3014_v13 = vpop.f32.mrb[92].mxu0  ;;  %2167 = vrot.lane.b32.xlu1 %v3176_v50, %s3201_s13 }
 0x308   :  { %v1795_v9 = vadd.f32 %v3014_v13, %v3882_v11  ;;  %v1789_v54 = vpop.f32.mrb[93].mxu0  ;;  %2169 = vrot.lane.b32.xlu0 %v3178_v63, %s3201_s13  ;;  %v3180_v57 = vpop.eup %3179 }
 0x309   :  { %3189 = vpow2.f32 %v1989_v51  ;;  %v1790_v23 = vadd.f32 %v3882_v11, %v1789_v54 }
 0x30a   :  { %1870 = vst.msk [vmem:[%s4531_s7 + $0x1e8] sm:$0xff] %vm1808_vm2, %v1795_v9  ;;  %3191 = vpow2.f32 %v1991_v52  ;;  %v1995_v61 = vmul.f32 1.442695, %v1795_v9 }
 0x30b   :  { %v3182_v21 = vpop.eup %3181  ;;  %1869 = vst.msk [vmem:[%s4531_s7 + $0x1e0] sm:$0xff] %vm1808_vm2, %v1790_v23  ;;  %v1993_v60 = vmul.f32 1.442695, %v1790_v23  ;;  %v3017_v34 = vpop.f32.mrb[94].mxu0  ;;  %2171 = vrot.lane.b32.xlu1 %v3180_v57, %s3201_s13 }
 0x30c   :  { %v1805_v32 = vadd.f32 %v3017_v34, %v3882_v11  ;;  %v1799_v0 = vpop.f32.mrb[95].mxu0  ;;  %2173 = vrot.lane.b32.xlu0 %v3182_v21, %s3201_s13  ;;  %v3184_v3 = vpop.eup %3183 }
 0x30d   :  { %3193 = vpow2.f32 %v1993_v60  ;;  %v1800_v48 = vadd.f32 %v3882_v11, %v1799_v0 }
 0x30e   :  { %1872 = vst.msk [vmem:[%s4531_s7 + $0x1f8] sm:$0xff] %vm1808_vm2, %v1805_v32  ;;  %3195 = vpow2.f32 %v1995_v61  ;;  %v1999_v6 = vmul.f32 1.442695, %v1805_v32 }
 0x30f   :  { %v3186_v42 = vpop.eup %3185  ;;  %1871 = vst.msk [vmem:[%s4531_s7 + $0x1f0] sm:$0xff] %vm1808_vm2, %v1800_v48  ;;  %v1997_v47 = vmul.f32 1.442695, %v1800_v48  ;;  %2175 = vrot.lane.b32.xlu1 %v3184_v3, %s3201_s13 }
 0x310   :  { %2177 = vrot.lane.b32.xlu0 %v3186_v42, %s3201_s13  ;;  %v3188_v62 = vpop.eup %3187 }
 0x311   :  { %3197 = vpow2.f32 %v1997_v47  ;;  %v2068_v11 = vpop.permute.xlu0 %2067 }
 0x312   :  { %2258 = vst.msk [vmem:[%s4532_s8 + $0x8] sm:$0xff] %vm1808_vm2, %v2068_v11  ;;  %3199 = vpow2.f32 %v1999_v6 }
 0x313   :  { %v3190_v7 = vpop.eup %3189  ;;  %2179 = vrot.lane.b32.xlu1 %v3188_v62, %s3201_s13 }
 0x314   :  { %2181 = vrot.lane.b32.xlu0 %v3190_v7, %s3201_s13  ;;  %v3192_v27 = vpop.eup %3191 }
 0x315   :  { %v2072_v8 = vpop.permute.xlu1 %2071  ;;  %v2066_v43 = vpop.permute.xlu0 %2065 }
 0x316   :  { %2260 = vst.msk [vmem:[%s4532_s8 + $0x18] sm:$0xff] %vm1808_vm2, %v2072_v8  ;;  %2257 = vst.msk [vmem:[%s4532_s8] sm:$0xff] %vm1808_vm2, %v2066_v43 }
 0x317   :  { %v3194_v58 = vpop.eup %3193  ;;  %2183 = vrot.lane.b32.xlu1 %v3192_v27, %s3201_s13 }
 0x318   :  { %2185 = vrot.lane.b32.xlu0 %v3194_v58, %s3201_s13  ;;  %v3196_v14 = vpop.eup %3195 }
 0x319   :  { %v2070_v5 = vpop.permute.xlu1 %2069 }
 0x31a   :  { %2259 = vst.msk [vmem:[%s4532_s8 + $0x10] sm:$0xff] %vm1808_vm2, %v2070_v5  ;;  %v2074_v59 = vpop.permute.xlu0 %2073 }
 0x31b   :  { %v3198_v15 = vpop.eup %3197  ;;  %2261 = vst.msk [vmem:[%s4532_s8 + $0x20] sm:$0xff] %vm1808_vm2, %v2074_v59  ;;  %2187 = vrot.lane.b32.xlu1 %v3196_v14, %s3201_s13 }
 0x31c   :  { %2189 = vrot.lane.b32.xlu0 %v3198_v15, %s3201_s13  ;;  %v3200_v17 = vpop.eup %3199 }
 0x31d   :  { %v2076_v16 = vpop.permute.xlu1 %2075 }
 0x31e   :  { %2262 = vst.msk [vmem:[%s4532_s8 + $0x28] sm:$0xff] %vm1808_vm2, %v2076_v16  ;;  %v2078_v55 = vpop.permute.xlu0 %2077 }
 0x31f   :  { %2263 = vst.msk [vmem:[%s4532_s8 + $0x30] sm:$0xff] %vm1808_vm2, %v2078_v55  ;;  %2191 = vrot.lane.b32.xlu1 %v3200_v17, %s3201_s13 }
 0x321   :  { %v2080_v19 = vpop.permute.xlu1 %2079 }
 0x322   :  { %2264 = vst.msk [vmem:[%s4532_s8 + $0x38] sm:$0xff] %vm1808_vm2, %v2080_v19  ;;  %v2082_v4 = vpop.permute.xlu0 %2081 }
 0x323   :  { %2265 = vst.msk [vmem:[%s4532_s8 + $0x40] sm:$0xff] %vm1808_vm2, %v2082_v4 }
 0x325   :  { %v2084_v22 = vpop.permute.xlu1 %2083 }
 0x326   :  { %2266 = vst.msk [vmem:[%s4532_s8 + $0x48] sm:$0xff] %vm1808_vm2, %v2084_v22  ;;  %v2086_v2 = vpop.permute.xlu0 %2085 }
 0x327   :  { %2267 = vst.msk [vmem:[%s4532_s8 + $0x50] sm:$0xff] %vm1808_vm2, %v2086_v2 }
 0x329   :  { %v2088_v24 = vpop.permute.xlu1 %2087 }
 0x32a   :  { %2268 = vst.msk [vmem:[%s4532_s8 + $0x58] sm:$0xff] %vm1808_vm2, %v2088_v24  ;;  %v2090_v12 = vpop.permute.xlu0 %2089 }
 0x32b   :  { %2269 = vst.msk [vmem:[%s4532_s8 + $0x60] sm:$0xff] %vm1808_vm2, %v2090_v12 }
 0x32d   :  { %v2092_v25 = vpop.permute.xlu1 %2091 }
 0x32e   :  { %2270 = vst.msk [vmem:[%s4532_s8 + $0x68] sm:$0xff] %vm1808_vm2, %v2092_v25  ;;  %v2094_v10 = vpop.permute.xlu0 %2093 }
 0x32f   :  { %2271 = vst.msk [vmem:[%s4532_s8 + $0x70] sm:$0xff] %vm1808_vm2, %v2094_v10 }
 0x331   :  { %v2096_v28 = vpop.permute.xlu1 %2095 }
 0x332   :  { %2272 = vst.msk [vmem:[%s4532_s8 + $0x78] sm:$0xff] %vm1808_vm2, %v2096_v28  ;;  %v2098_v20 = vpop.permute.xlu0 %2097 }
 0x333   :  { %2273 = vst.msk [vmem:[%s4532_s8 + $0x80] sm:$0xff] %vm1808_vm2, %v2098_v20 }
 0x335   :  { %v2100_v30 = vpop.permute.xlu1 %2099 }
 0x336   :  { %2274 = vst.msk [vmem:[%s4532_s8 + $0x88] sm:$0xff] %vm1808_vm2, %v2100_v30  ;;  %v2102_v18 = vpop.permute.xlu0 %2101 }
 0x337   :  { %2275 = vst.msk [vmem:[%s4532_s8 + $0x90] sm:$0xff] %vm1808_vm2, %v2102_v18 }
 0x339   :  { %v2104_v31 = vpop.permute.xlu1 %2103 }
 0x33a   :  { %2276 = vst.msk [vmem:[%s4532_s8 + $0x98] sm:$0xff] %vm1808_vm2, %v2104_v31  ;;  %v2106_v29 = vpop.permute.xlu0 %2105 }
 0x33b   :  { %2277 = vst.msk [vmem:[%s4532_s8 + $0xa0] sm:$0xff] %vm1808_vm2, %v2106_v29 }
 0x33d   :  { %v2108_v33 = vpop.permute.xlu1 %2107 }
 0x33e   :  { %2278 = vst.msk [vmem:[%s4532_s8 + $0xa8] sm:$0xff] %vm1808_vm2, %v2108_v33  ;;  %v2110_v26 = vpop.permute.xlu0 %2109 }
 0x33f   :  { %2279 = vst.msk [vmem:[%s4532_s8 + $0xb0] sm:$0xff] %vm1808_vm2, %v2110_v26 }
 0x341   :  { %v2112_v36 = vpop.permute.xlu1 %2111 }
 0x342   :  { %2280 = vst.msk [vmem:[%s4532_s8 + $0xb8] sm:$0xff] %vm1808_vm2, %v2112_v36  ;;  %v2114_v37 = vpop.permute.xlu0 %2113 }
 0x343   :  { %2281 = vst.msk [vmem:[%s4532_s8 + $0xc0] sm:$0xff] %vm1808_vm2, %v2114_v37 }
 0x345   :  { %v2116_v38 = vpop.permute.xlu1 %2115 }
 0x346   :  { %2282 = vst.msk [vmem:[%s4532_s8 + $0xc8] sm:$0xff] %vm1808_vm2, %v2116_v38  ;;  %v2118_v35 = vpop.permute.xlu0 %2117 }
 0x347   :  { %2283 = vst.msk [vmem:[%s4532_s8 + $0xd0] sm:$0xff] %vm1808_vm2, %v2118_v35 }
 0x349   :  { %v2120_v39 = vpop.permute.xlu1 %2119 }
 0x34a   :  { %2284 = vst.msk [vmem:[%s4532_s8 + $0xd8] sm:$0xff] %vm1808_vm2, %v2120_v39  ;;  %v2122_v46 = vpop.permute.xlu0 %2121 }
 0x34b   :  { %2285 = vst.msk [vmem:[%s4532_s8 + $0xe0] sm:$0xff] %vm1808_vm2, %v2122_v46 }
 0x34d   :  { %v2124_v40 = vpop.permute.xlu1 %2123 }
 0x34e   :  { %2286 = vst.msk [vmem:[%s4532_s8 + $0xe8] sm:$0xff] %vm1808_vm2, %v2124_v40  ;;  %v2126_v44 = vpop.permute.xlu0 %2125 }
 0x34f   :  { %2287 = vst.msk [vmem:[%s4532_s8 + $0xf0] sm:$0xff] %vm1808_vm2, %v2126_v44 }
 0x351   :  { %v2128_v41 = vpop.permute.xlu1 %2127 }
 0x352   :  { %2288 = vst.msk [vmem:[%s4532_s8 + $0xf8] sm:$0xff] %vm1808_vm2, %v2128_v41  ;;  %v2130_v56 = vpop.permute.xlu0 %2129 }
 0x353   :  { %2289 = vst.msk [vmem:[%s4532_s8 + $0x100] sm:$0xff] %vm1808_vm2, %v2130_v56 }
 0x355   :  { %v2132_v45 = vpop.permute.xlu1 %2131 }
 0x356   :  { %2290 = vst.msk [vmem:[%s4532_s8 + $0x108] sm:$0xff] %vm1808_vm2, %v2132_v45  ;;  %v2134_v53 = vpop.permute.xlu0 %2133 }
 0x357   :  { %2291 = vst.msk [vmem:[%s4532_s8 + $0x110] sm:$0xff] %vm1808_vm2, %v2134_v53 }
 0x359   :  { %v2136_v49 = vpop.permute.xlu1 %2135 }
 0x35a   :  { %2292 = vst.msk [vmem:[%s4532_s8 + $0x118] sm:$0xff] %vm1808_vm2, %v2136_v49  ;;  %v2138_v1 = vpop.permute.xlu0 %2137 }
 0x35b   :  { %2293 = vst.msk [vmem:[%s4532_s8 + $0x120] sm:$0xff] %vm1808_vm2, %v2138_v1 }
 0x35d   :  { %v2140_v50 = vpop.permute.xlu1 %2139 }
 0x35e   :  { %2294 = vst.msk [vmem:[%s4532_s8 + $0x128] sm:$0xff] %vm1808_vm2, %v2140_v50  ;;  %v2142_v63 = vpop.permute.xlu0 %2141 }
 0x35f   :  { %2295 = vst.msk [vmem:[%s4532_s8 + $0x130] sm:$0xff] %vm1808_vm2, %v2142_v63 }
 0x361   :  { %v2144_v51 = vpop.permute.xlu1 %2143 }
 0x362   :  { %2296 = vst.msk [vmem:[%s4532_s8 + $0x138] sm:$0xff] %vm1808_vm2, %v2144_v51  ;;  %v2146_v13 = vpop.permute.xlu0 %2145 }
 0x363   :  { %2297 = vst.msk [vmem:[%s4532_s8 + $0x140] sm:$0xff] %vm1808_vm2, %v2146_v13 }
 0x365   :  { %v2148_v52 = vpop.permute.xlu1 %2147 }
 0x366   :  { %2298 = vst.msk [vmem:[%s4532_s8 + $0x148] sm:$0xff] %vm1808_vm2, %v2148_v52  ;;  %v2150_v9 = vpop.permute.xlu0 %2149 }
 0x367   :  { %2299 = vst.msk [vmem:[%s4532_s8 + $0x150] sm:$0xff] %vm1808_vm2, %v2150_v9 }
 0x369   :  { %v2152_v54 = vpop.permute.xlu1 %2151 }
 0x36a   :  { %2300 = vst.msk [vmem:[%s4532_s8 + $0x158] sm:$0xff] %vm1808_vm2, %v2152_v54  ;;  %v2154_v23 = vpop.permute.xlu0 %2153 }
 0x36b   :  { %2301 = vst.msk [vmem:[%s4532_s8 + $0x160] sm:$0xff] %vm1808_vm2, %v2154_v23 }
 0x36d   :  { %v2156_v57 = vpop.permute.xlu1 %2155 }
 0x36e   :  { %2302 = vst.msk [vmem:[%s4532_s8 + $0x168] sm:$0xff] %vm1808_vm2, %v2156_v57  ;;  %v2158_v21 = vpop.permute.xlu0 %2157 }
 0x36f   :  { %2303 = vst.msk [vmem:[%s4532_s8 + $0x170] sm:$0xff] %vm1808_vm2, %v2158_v21 }
 0x371   :  { %v2160_v60 = vpop.permute.xlu1 %2159 }
 0x372   :  { %2304 = vst.msk [vmem:[%s4532_s8 + $0x178] sm:$0xff] %vm1808_vm2, %v2160_v60  ;;  %v2162_v34 = vpop.permute.xlu0 %2161 }
 0x373   :  { %2305 = vst.msk [vmem:[%s4532_s8 + $0x180] sm:$0xff] %vm1808_vm2, %v2162_v34 }
 0x375   :  { %v2164_v61 = vpop.permute.xlu1 %2163 }
 0x376   :  { %2306 = vst.msk [vmem:[%s4532_s8 + $0x188] sm:$0xff] %vm1808_vm2, %v2164_v61  ;;  %v2166_v32 = vpop.permute.xlu0 %2165 }
 0x377   :  { %2307 = vst.msk [vmem:[%s4532_s8 + $0x190] sm:$0xff] %vm1808_vm2, %v2166_v32 }
 0x379   :  { %v2168_v0 = vpop.permute.xlu1 %2167 }
 0x37a   :  { %2308 = vst.msk [vmem:[%s4532_s8 + $0x198] sm:$0xff] %vm1808_vm2, %v2168_v0  ;;  %v2170_v48 = vpop.permute.xlu0 %2169 }
 0x37b   :  { %2309 = vst.msk [vmem:[%s4532_s8 + $0x1a0] sm:$0xff] %vm1808_vm2, %v2170_v48 }
 0x37d   :  { %v2172_v3 = vpop.permute.xlu1 %2171 }
 0x37e   :  { %2310 = vst.msk [vmem:[%s4532_s8 + $0x1a8] sm:$0xff] %vm1808_vm2, %v2172_v3  ;;  %v2174_v42 = vpop.permute.xlu0 %2173 }
 0x37f   :  { %2311 = vst.msk [vmem:[%s4532_s8 + $0x1b0] sm:$0xff] %vm1808_vm2, %v2174_v42 }
 0x381   :  { %v2176_v47 = vpop.permute.xlu1 %2175 }
 0x382   :  { %2312 = vst.msk [vmem:[%s4532_s8 + $0x1b8] sm:$0xff] %vm1808_vm2, %v2176_v47  ;;  %v2178_v6 = vpop.permute.xlu0 %2177 }
 0x383   :  { %2313 = vst.msk [vmem:[%s4532_s8 + $0x1c0] sm:$0xff] %vm1808_vm2, %v2178_v6 }
 0x385   :  { %v2180_v11 = vpop.permute.xlu1 %2179 }
 0x386   :  { %2314 = vst.msk [vmem:[%s4532_s8 + $0x1c8] sm:$0xff] %vm1808_vm2, %v2180_v11  ;;  %v2182_v62 = vpop.permute.xlu0 %2181 }
 0x387   :  { %2315 = vst.msk [vmem:[%s4532_s8 + $0x1d0] sm:$0xff] %vm1808_vm2, %v2182_v62 }
 0x389   :  { %v2184_v7 = vpop.permute.xlu1 %2183 }
 0x38a   :  { %2316 = vst.msk [vmem:[%s4532_s8 + $0x1d8] sm:$0xff] %vm1808_vm2, %v2184_v7  ;;  %v2186_v8 = vpop.permute.xlu0 %2185 }
 0x38b   :  { %2317 = vst.msk [vmem:[%s4532_s8 + $0x1e0] sm:$0xff] %vm1808_vm2, %v2186_v8 }
 0x38d   :  { %v2188_v43 = vpop.permute.xlu1 %2187 }
 0x38e   :  { %2318 = vst.msk [vmem:[%s4532_s8 + $0x1e8] sm:$0xff] %vm1808_vm2, %v2188_v43  ;;  %v2190_v27 = vpop.permute.xlu0 %2189 }
 0x38f   :  { %2319 = vst.msk [vmem:[%s4532_s8 + $0x1f0] sm:$0xff] %vm1808_vm2, %v2190_v27 }
 0x391   :  { %v2192_v58 = vpop.permute.xlu1 %2191 }
 0x392   :  { %2320 = vst.msk [vmem:[%s4532_s8 + $0x1f8] sm:$0xff] %vm1808_vm2, %v2192_v58 }

</bundles_post_ra>
